<compile_context>
chip_gen: v7x
topology: tpu7x:2x2x1
jax: 0.10.0
libtpu: 0.0.40
codegen_flags: <defaults>
</compile_context>

<pallas_src>
import functools

import jax
import jax.numpy as jnp
from jax.experimental import pallas as pl
from jax.experimental.pallas import tpu as pltpu


def _round_up(x, m):
    return ((x + m - 1) // m) * m


# ----------------------------------------------------------------------------
# Pallas kernels
# ----------------------------------------------------------------------------
def _conv_bn_relu_pool_kernel(x_ref, w_ref, b_ref, o_ref):
    """Fused conv (im2col matmul) + folded-BN bias + ReLU + 2x2 max-pool.

    x_ref : (4, TM, K)  bf16  -- 4 pooling phases of the same TM pooled rows
    w_ref : (K, C)      bf16  -- conv weight with BN scale folded in
    b_ref : (1, C)      f32   -- conv bias with BN folded in
    o_ref : (TM, C)     f32   -- pooled activation rows
    """
    w = w_ref[...]
    z = jnp.dot(x_ref[0], w, preferred_element_type=jnp.float32)
    for p in range(1, 4):                       # static unroll over pool phases
        zp = jnp.dot(x_ref[p], w, preferred_element_type=jnp.float32)
        z = jnp.maximum(z, zp)
    o_ref[...] = jnp.maximum(z + b_ref[...], 0.0)


def _mlp_kernel(x_ref, w0_ref, b0_ref, w1_ref, b1_ref, w2_ref, b2_ref, o_ref):
    """Fused fc(256->120) + ReLU + fc1(120->84) + ReLU + fc2(84->C_pad)."""
    h = jnp.dot(x_ref[...], w0_ref[...], preferred_element_type=jnp.float32)
    h = jnp.maximum(h + b0_ref[...], 0.0)
    h = jnp.dot(h.astype(jnp.bfloat16), w1_ref[...],
                preferred_element_type=jnp.float32)
    h = jnp.maximum(h + b1_ref[...], 0.0)
    h = jnp.dot(h.astype(jnp.bfloat16), w2_ref[...],
                preferred_element_type=jnp.float32)
    o_ref[...] = h + b2_ref[...]


_COMPILER_PARAMS = pltpu.CompilerParams(
    dimension_semantics=("parallel",),
    vmem_limit_bytes=32 * 1024 * 1024,
)


# ----------------------------------------------------------------------------
# Pallas wrappers (row-tiled, pipelined)
# ----------------------------------------------------------------------------
def conv_bn_relu_pool(patches, w, b, *, block_rows=512):
    """patches:(4, M, K) -> pooled activation (M, C) f32."""
    _, M, K = patches.shape
    C = w.shape[1]
    TM = min(block_rows, _round_up(M, 8))
    M_pad = _round_up(M, TM)
    if M_pad != M:
        patches = jnp.pad(patches, ((0, 0), (0, M_pad - M), (0, 0)))
    out = pl.pallas_call(
        _conv_bn_relu_pool_kernel,
        out_shape=jax.ShapeDtypeStruct((M_pad, C), jnp.float32),
        grid_spec=pltpu.PrefetchScalarGridSpec(
            num_scalar_prefetch=0,
            grid=(M_pad // TM,),
            in_specs=[
                pl.BlockSpec((4, TM, K), lambda i: (0, i, 0)),
                pl.BlockSpec((K, C), lambda i: (0, 0)),
                pl.BlockSpec((1, C), lambda i: (0, 0)),
            ],
            out_specs=pl.BlockSpec((TM, C), lambda i: (i, 0)),
        ),
        compiler_params=_COMPILER_PARAMS,
    )(patches.astype(jnp.bfloat16), w, b.reshape(1, C))
    return out[:M]


def mlp_head(flat, p, *, block_rows=512):
    """flat:(N, 256) (h,w,c-ordered features) -> logits (N, C_pad) f32."""
    N, F = flat.shape
    w0, b0 = p["fcw"], p["fcb"]
    w1, b1 = p["fc1w"], p["fc1b"]
    w2, b2 = p["fc2w_pad"], p["fc2b_pad"]
    C_out = w2.shape[1]

    TM = min(block_rows, _round_up(N, 8))
    N_pad = _round_up(N, TM)
    if N_pad != N:
        flat = jnp.pad(flat, ((0, N_pad - N), (0, 0)))

    def full_spec(arr):
        nd = arr.ndim
        return pl.BlockSpec(arr.shape, lambda i, _nd=nd: (0,) * _nd)

    out = pl.pallas_call(
        _mlp_kernel,
        out_shape=jax.ShapeDtypeStruct((N_pad, C_out), jnp.float32),
        grid_spec=pltpu.PrefetchScalarGridSpec(
            num_scalar_prefetch=0,
            grid=(N_pad // TM,),
            in_specs=[
                pl.BlockSpec((TM, F), lambda i: (i, 0)),
                full_spec(w0), full_spec(b0.reshape(1, -1)),
                full_spec(w1), full_spec(b1.reshape(1, -1)),
                full_spec(w2), full_spec(b2.reshape(1, -1)),
            ],
            out_specs=pl.BlockSpec((TM, C_out), lambda i: (i, 0)),
        ),
        compiler_params=_COMPILER_PARAMS,
    )(flat.astype(jnp.bfloat16),
      w0, b0.reshape(1, -1),
      w1, b1.reshape(1, -1),
      w2, b2.reshape(1, -1))
    return out[:N]


# ----------------------------------------------------------------------------
# JAX glue: pooled-phase im2col (patch extraction only; bf16-fed to kernels)
# ----------------------------------------------------------------------------
def im2col_pooled(x, k):
    """x:(N,H,W,C) -> (4, N*PH*PW, k*k*C) patches grouped by 2x2 pool phase.

    Row ordering is (n, ph, pw); feature ordering is (kh, kw, c), matching the
    folded weight layout.
    """
    N, H, W, C = x.shape
    OH, OW = H - k + 1, W - k + 1
    PH, PW = OH // 2, OW // 2
    phases = []
    for di in range(2):
        for dj in range(2):
            cols = []
            for kh in range(k):
                for kw in range(k):
                    sl = x[:, di + kh: di + kh + 2 * PH: 2,
                              dj + kw: dj + kw + 2 * PW: 2, :]   # (N,PH,PW,C)
                    cols.append(sl)
            ph = jnp.stack(cols, axis=3)                          # (N,PH,PW,k*k,C)
            phases.append(ph.reshape(N * PH * PW, k * k * C))
    return jnp.stack(phases, axis=0), (N, PH, PW)


# ----------------------------------------------------------------------------
# Parameters: synthetic PyTorch-shaped init, BN folded, layouts pre-permuted
# ----------------------------------------------------------------------------
def init_params(key, classes, eps=1e-5):
    ks = jax.random.split(key, 18)
    nrm = lambda k, s, std=0.1: jax.random.normal(k, s, jnp.float32) * std
    p = {}

    def fold_conv(kw_, kb_, kg_, kbe_, km_, kv_, cin, cout):
        w_pt = nrm(kw_, (cout, cin, 5, 5))                 # PyTorch (O,Cin,kh,kw)
        b_pt = nrm(kb_, (cout,))
        gamma = 1.0 + nrm(kg_, (cout,), 0.05)
        beta = nrm(kbe_, (cout,), 0.05)
        mean = nrm(km_, (cout,), 0.05)
        var = 1.0 + jnp.abs(nrm(kv_, (cout,), 0.05))
        scale = gamma / jnp.sqrt(var + eps)
        # (kh, kw, cin) row ordering to match im2col_pooled feature order.
        w_hwc = jnp.transpose(w_pt, (2, 3, 1, 0)).reshape(25 * cin, cout)
        w_fold = (w_hwc * scale[None, :]).astype(jnp.bfloat16)
        b_fold = ((b_pt - mean) * scale + beta).astype(jnp.float32)
        return w_fold, b_fold

    p["w1"], p["b1"] = fold_conv(ks[0], ks[1], ks[2], ks[3], ks[4], ks[5], 1, 6)
    p["w2"], p["b2"] = fold_conv(ks[6], ks[7], ks[8], ks[9], ks[10], ks[11], 6, 16)

    # fc: PyTorch weight (120, 256) expects features in (c,h,w) order; our conv
    # kernel emits (h,w,c)-ordered features, so permute the columns once here.
    fcw_pt = nrm(ks[12], (120, 256))
    p["fcw"] = (fcw_pt.reshape(120, 16, 4, 4)
                      .transpose(2, 3, 1, 0)               # (h,w,c,out)
                      .reshape(256, 120).astype(jnp.bfloat16))
    p["fcb"] = nrm(ks[13], (120,))

    p["fc1w"] = nrm(ks[14], (84, 120)).T.astype(jnp.bfloat16)
    p["fc1b"] = nrm(ks[15], (84,))

    # Final layer: pad output columns to 128 for lane-dense stores.
    c_pad = _round_up(classes, 128)
    fc2w_pt = nrm(ks[16], (classes, 84))
    fc2b_pt = nrm(ks[17], (classes,))
    w2p = jnp.zeros((84, c_pad), jnp.float32).at[:, :classes].set(fc2w_pt.T)
    b2p = jnp.zeros((c_pad,), jnp.float32).at[:classes].set(fc2b_pt)
    p["fc2w_pad"] = w2p.astype(jnp.bfloat16)
    p["fc2b_pad"] = b2p
    return p


# ----------------------------------------------------------------------------
# Forward pass (mirrors EMNIST.forward; BatchNorm in eval mode, folded)
# ----------------------------------------------------------------------------
def emnist_forward(x_nchw, params, classes):
    x = jnp.transpose(x_nchw, (0, 2, 3, 1)).astype(jnp.float32)   # NCHW -> NHWC
    N = x.shape[0]

    # layer1: conv(1->6,k5) + BN + ReLU + maxpool2, fully fused in one kernel.
    patches, (_, PH1, PW1) = im2col_pooled(x, 5)            # (4, N*144, 25)
    y = conv_bn_relu_pool(patches, params["w1"], params["b1"])    # (N*144, 6)
    y = y.reshape(N, PH1, PW1, 6)                           # (N,12,12,6)

    # layer2: conv(6->16,k5) + BN + ReLU + maxpool2, fused.
    patches, (_, PH2, PW2) = im2col_pooled(y, 5)            # (4, N*16, 150)
    y = conv_bn_relu_pool(patches, params["w2"], params["b2"])    # (N*16, 16)
    flat = y.reshape(N, PH2 * PW2 * 16)                     # (N,256) (h,w,c)

    # fused fc -> relu -> fc1 -> relu -> fc2 (fc weight pre-permuted to h,w,c).
    logits = mlp_head(flat, params)                          # (N, 128)
    return logits[:, :classes]


if __name__ == "__main__":
    CLASSES = 26
    key = jax.random.PRNGKey(0)
    k_x, k_p = jax.random.split(key)
    # fc expects 256 = 16*4*4 features => 28x28 single-channel input (EMNIST).
    x = jax.random.normal(k_x, (2, 1, 28, 28), dtype=jnp.float32)
    params = init_params(k_p, CLASSES)

    fwd = jax.jit(functools.partial(emnist_forward, classes=CLASSES))
    logits = fwd(x, params)
    jax.block_until_ready(logits)
    assert logits.shape == (2, CLASSES) and logits.dtype == jnp.float32
    print("KERNEL_OK")
</pallas_src>

<mosaic_0001>
module attributes {stable_mosaic.version = 11 : i64} {
  func.func @_conv_bn_relu_pool_kernel(%arg0: i32, %arg1: memref<4x288x25xbf16, #tpu.memory_space<vmem>>, %arg2: memref<25x6xbf16, #tpu.memory_space<vmem>>, %arg3: memref<1x6xf32, #tpu.memory_space<vmem>>, %arg4: memref<288x6xf32, #tpu.memory_space<vmem>>) attributes {dimension_semantics = [#tpu.dimension_semantics<parallel>], iteration_bounds = array<i64: 1>, scalar_prefetch = 0 : i64, scratch_operands = 0 : i64, tpu.core_type = #tpu.core_type<tc>, window_params = [{transform_indices = @transform_0, window_bounds = array<i64: 4, 288, 25>}, {pipeline_mode = #tpu.pipeline_mode<synchronous>, transform_indices = @transform_1, window_bounds = array<i64: 25, 6>}, {pipeline_mode = #tpu.pipeline_mode<synchronous>, transform_indices = @transform_2, window_bounds = array<i64: 1, 6>}, {transform_indices = @transform_3, window_bounds = array<i64: 288, 6>}]} {
    %c0 = arith.constant 0 : index
    %c0_0 = arith.constant 0 : index
    %0 = vector.load %arg2[%c0, %c0_0] : memref<25x6xbf16, #tpu.memory_space<vmem>>, vector<25x6xbf16>
    %c0_1 = arith.constant 0 : index
    %c0_2 = arith.constant 0 : index
    %c0_3 = arith.constant 0 : index
    %1 = vector.load %arg1[%c0_1, %c0_2, %c0_3] : memref<4x288x25xbf16, #tpu.memory_space<vmem>>, vector<1x288x25xbf16>
    %2 = vector.shape_cast %1 : vector<1x288x25xbf16> to vector<288x25xbf16>
    %cst = arith.constant dense<0.000000e+00> : vector<288x6xf32>
    %3 = tpu.matmul %2, %0, %cst {dimension_numbers = #tpu.dot_dimension_numbers<[1], [0], [0], [1], [0, 0, 1, 1], [], []>} : vector<288x25xbf16>, vector<25x6xbf16>, vector<288x6xf32> -> vector<288x6xf32>
    %c1 = arith.constant 1 : index
    %c0_4 = arith.constant 0 : index
    %c0_5 = arith.constant 0 : index
    %4 = vector.load %arg1[%c1, %c0_4, %c0_5] : memref<4x288x25xbf16, #tpu.memory_space<vmem>>, vector<1x288x25xbf16>
    %5 = vector.shape_cast %4 : vector<1x288x25xbf16> to vector<288x25xbf16>
    %cst_6 = arith.constant dense<0.000000e+00> : vector<288x6xf32>
    %6 = tpu.matmul %5, %0, %cst_6 {dimension_numbers = #tpu.dot_dimension_numbers<[1], [0], [0], [1], [0, 0, 1, 1], [], []>} : vector<288x25xbf16>, vector<25x6xbf16>, vector<288x6xf32> -> vector<288x6xf32>
    %7 = arith.maximumf %3, %6 : vector<288x6xf32>
    %c2 = arith.constant 2 : index
    %c0_7 = arith.constant 0 : index
    %c0_8 = arith.constant 0 : index
    %8 = vector.load %arg1[%c2, %c0_7, %c0_8] : memref<4x288x25xbf16, #tpu.memory_space<vmem>>, vector<1x288x25xbf16>
    %9 = vector.shape_cast %8 : vector<1x288x25xbf16> to vector<288x25xbf16>
    %cst_9 = arith.constant dense<0.000000e+00> : vector<288x6xf32>
    %10 = tpu.matmul %9, %0, %cst_9 {dimension_numbers = #tpu.dot_dimension_numbers<[1], [0], [0], [1], [0, 0, 1, 1], [], []>} : vector<288x25xbf16>, vector<25x6xbf16>, vector<288x6xf32> -> vector<288x6xf32>
    %11 = arith.maximumf %7, %10 : vector<288x6xf32>
    %c3 = arith.constant 3 : index
    %c0_10 = arith.constant 0 : index
    %c0_11 = arith.constant 0 : index
    %12 = vector.load %arg1[%c3, %c0_10, %c0_11] : memref<4x288x25xbf16, #tpu.memory_space<vmem>>, vector<1x288x25xbf16>
    %13 = vector.shape_cast %12 : vector<1x288x25xbf16> to vector<288x25xbf16>
    %cst_12 = arith.constant dense<0.000000e+00> : vector<288x6xf32>
    %14 = tpu.matmul %13, %0, %cst_12 {dimension_numbers = #tpu.dot_dimension_numbers<[1], [0], [0], [1], [0, 0, 1, 1], [], []>} : vector<288x25xbf16>, vector<25x6xbf16>, vector<288x6xf32> -> vector<288x6xf32>
    %15 = arith.maximumf %11, %14 : vector<288x6xf32>
    %c0_13 = arith.constant 0 : index
    %c0_14 = arith.constant 0 : index
    %16 = vector.load %arg3[%c0_13, %c0_14] : memref<1x6xf32, #tpu.memory_space<vmem>>, vector<1x6xf32>
    %17 = vector.broadcast %16 : vector<1x6xf32> to vector<288x6xf32>
    %18 = arith.addf %15, %17 : vector<288x6xf32>
    %cst_15 = arith.constant 0.000000e+00 : f32
    %19 = vector.broadcast %cst_15 : f32 to vector<288x6xf32>
    %20 = arith.maximumf %18, %19 : vector<288x6xf32>
    %c0_16 = arith.constant 0 : index
    %c0_17 = arith.constant 0 : index
    %21 = vector.load %arg4[%c0_16, %c0_17] : memref<288x6xf32, #tpu.memory_space<vmem>>, vector<288x6xf32>
    tpu.vector_store %arg4[%c0_16, %c0_17], %20 {strides = array<i32>} : memref<288x6xf32, #tpu.memory_space<vmem>>, vector<288x6xf32>,
    return
  }
  func.func @transform_0(%arg0: i32) -> (i32, i32, i32) {
    %c0_i32 = arith.constant 0 : i32
    %c0_i32_0 = arith.constant 0 : i32
    %c0_i32_1 = arith.constant 0 : i32
    return %c0_i32, %arg0, %c0_i32_0 : i32, i32, i32
  }
  func.func @transform_1(%arg0: i32) -> (i32, i32) {
    %c0_i32 = arith.constant 0 : i32
    %c0_i32_0 = arith.constant 0 : i32
    %c0_i32_1 = arith.constant 0 : i32
    return %c0_i32, %c0_i32_0 : i32, i32
  }
  func.func @transform_2(%arg0: i32) -> (i32, i32) {
    %c0_i32 = arith.constant 0 : i32
    %c0_i32_0 = arith.constant 0 : i32
    %c0_i32_1 = arith.constant 0 : i32
    return %c0_i32, %c0_i32_0 : i32, i32
  }
  func.func @transform_3(%arg0: i32) -> (i32, i32) {
    %c0_i32 = arith.constant 0 : i32
    %c0_i32_0 = arith.constant 0 : i32
    return %arg0, %c0_i32 : i32, i32
  }
}

module attributes {stable_mosaic.version = 11 : i64} {
  func.func @_conv_bn_relu_pool_kernel(%arg0: i32, %arg1: memref<4x32x150xbf16, #tpu.memory_space<vmem>>, %arg2: memref<150x16xbf16, #tpu.memory_space<vmem>>, %arg3: memref<1x16xf32, #tpu.memory_space<vmem>>, %arg4: memref<32x16xf32, #tpu.memory_space<vmem>>) attributes {dimension_semantics = [#tpu.dimension_semantics<parallel>], iteration_bounds = array<i64: 1>, scalar_prefetch = 0 : i64, scratch_operands = 0 : i64, tpu.core_type = #tpu.core_type<tc>, window_params = [{transform_indices = @transform_0, window_bounds = array<i64: 4, 32, 150>}, {pipeline_mode = #tpu.pipeline_mode<synchronous>, transform_indices = @transform_1, window_bounds = array<i64: 150, 16>}, {pipeline_mode = #tpu.pipeline_mode<synchronous>, transform_indices = @transform_2, window_bounds = array<i64: 1, 16>}, {transform_indices = @transform_3, window_bounds = array<i64: 32, 16>}]} {
    %c0 = arith.constant 0 : index
    %c0_0 = arith.constant 0 : index
    %0 = vector.load %arg2[%c0, %c0_0] : memref<150x16xbf16, #tpu.memory_space<vmem>>, vector<150x16xbf16>
    %c0_1 = arith.constant 0 : index
    %c0_2 = arith.constant 0 : index
    %c0_3 = arith.constant 0 : index
    %1 = vector.load %arg1[%c0_1, %c0_2, %c0_3] : memref<4x32x150xbf16, #tpu.memory_space<vmem>>, vector<1x32x150xbf16>
    %2 = vector.shape_cast %1 : vector<1x32x150xbf16> to vector<32x150xbf16>
    %cst = arith.constant dense<0.000000e+00> : vector<32x16xf32>
    %3 = tpu.matmul %2, %0, %cst {dimension_numbers = #tpu.dot_dimension_numbers<[1], [0], [0], [1], [0, 0, 1, 1], [], []>} : vector<32x150xbf16>, vector<150x16xbf16>, vector<32x16xf32> -> vector<32x16xf32>
    %c1 = arith.constant 1 : index
    %c0_4 = arith.constant 0 : index
    %c0_5 = arith.constant 0 : index
    %4 = vector.load %arg1[%c1, %c0_4, %c0_5] : memref<4x32x150xbf16, #tpu.memory_space<vmem>>, vector<1x32x150xbf16>
    %5 = vector.shape_cast %4 : vector<1x32x150xbf16> to vector<32x150xbf16>
    %cst_6 = arith.constant dense<0.000000e+00> : vector<32x16xf32>
    %6 = tpu.matmul %5, %0, %cst_6 {dimension_numbers = #tpu.dot_dimension_numbers<[1], [0], [0], [1], [0, 0, 1, 1], [], []>} : vector<32x150xbf16>, vector<150x16xbf16>, vector<32x16xf32> -> vector<32x16xf32>
    %7 = arith.maximumf %3, %6 : vector<32x16xf32>
    %c2 = arith.constant 2 : index
    %c0_7 = arith.constant 0 : index
    %c0_8 = arith.constant 0 : index
    %8 = vector.load %arg1[%c2, %c0_7, %c0_8] : memref<4x32x150xbf16, #tpu.memory_space<vmem>>, vector<1x32x150xbf16>
    %9 = vector.shape_cast %8 : vector<1x32x150xbf16> to vector<32x150xbf16>
    %cst_9 = arith.constant dense<0.000000e+00> : vector<32x16xf32>
    %10 = tpu.matmul %9, %0, %cst_9 {dimension_numbers = #tpu.dot_dimension_numbers<[1], [0], [0], [1], [0, 0, 1, 1], [], []>} : vector<32x150xbf16>, vector<150x16xbf16>, vector<32x16xf32> -> vector<32x16xf32>
    %11 = arith.maximumf %7, %10 : vector<32x16xf32>
    %c3 = arith.constant 3 : index
    %c0_10 = arith.constant 0 : index
    %c0_11 = arith.constant 0 : index
    %12 = vector.load %arg1[%c3, %c0_10, %c0_11] : memref<4x32x150xbf16, #tpu.memory_space<vmem>>, vector<1x32x150xbf16>
    %13 = vector.shape_cast %12 : vector<1x32x150xbf16> to vector<32x150xbf16>
    %cst_12 = arith.constant dense<0.000000e+00> : vector<32x16xf32>
    %14 = tpu.matmul %13, %0, %cst_12 {dimension_numbers = #tpu.dot_dimension_numbers<[1], [0], [0], [1], [0, 0, 1, 1], [], []>} : vector<32x150xbf16>, vector<150x16xbf16>, vector<32x16xf32> -> vector<32x16xf32>
    %15 = arith.maximumf %11, %14 : vector<32x16xf32>
    %c0_13 = arith.constant 0 : index
    %c0_14 = arith.constant 0 : index
    %16 = vector.load %arg3[%c0_13, %c0_14] : memref<1x16xf32, #tpu.memory_space<vmem>>, vector<1x16xf32>
    %17 = vector.broadcast %16 : vector<1x16xf32> to vector<32x16xf32>
    %18 = arith.addf %15, %17 : vector<32x16xf32>
    %cst_15 = arith.constant 0.000000e+00 : f32
    %19 = vector.broadcast %cst_15 : f32 to vector<32x16xf32>
    %20 = arith.maximumf %18, %19 : vector<32x16xf32>
    %c0_16 = arith.constant 0 : index
    %c0_17 = arith.constant 0 : index
    %21 = vector.load %arg4[%c0_16, %c0_17] : memref<32x16xf32, #tpu.memory_space<vmem>>, vector<32x16xf32>
    tpu.vector_store %arg4[%c0_16, %c0_17], %20 {strides = array<i32>} : memref<32x16xf32, #tpu.memory_space<vmem>>, vector<32x16xf32>,
    return
  }
  func.func @transform_0(%arg0: i32) -> (i32, i32, i32) {
    %c0_i32 = arith.constant 0 : i32
    %c0_i32_0 = arith.constant 0 : i32
    %c0_i32_1 = arith.constant 0 : i32
    return %c0_i32, %arg0, %c0_i32_0 : i32, i32, i32
  }
  func.func @transform_1(%arg0: i32) -> (i32, i32) {
    %c0_i32 = arith.constant 0 : i32
    %c0_i32_0 = arith.constant 0 : i32
    %c0_i32_1 = arith.constant 0 : i32
    return %c0_i32, %c0_i32_0 : i32, i32
  }
  func.func @transform_2(%arg0: i32) -> (i32, i32) {
    %c0_i32 = arith.constant 0 : i32
    %c0_i32_0 = arith.constant 0 : i32
    %c0_i32_1 = arith.constant 0 : i32
    return %c0_i32, %c0_i32_0 : i32, i32
  }
  func.func @transform_3(%arg0: i32) -> (i32, i32) {
    %c0_i32 = arith.constant 0 : i32
    %c0_i32_0 = arith.constant 0 : i32
    return %arg0, %c0_i32 : i32, i32
  }
}

module attributes {stable_mosaic.version = 11 : i64} {
  func.func @_mlp_kernel(%arg0: i32, %arg1: memref<8x256xbf16, #tpu.memory_space<vmem>>, %arg2: memref<256x120xbf16, #tpu.memory_space<vmem>>, %arg3: memref<1x120xf32, #tpu.memory_space<vmem>>, %arg4: memref<120x84xbf16, #tpu.memory_space<vmem>>, %arg5: memref<1x84xf32, #tpu.memory_space<vmem>>, %arg6: memref<84x128xbf16, #tpu.memory_space<vmem>>, %arg7: memref<1x128xf32, #tpu.memory_space<vmem>>, %arg8: memref<8x128xf32, #tpu.memory_space<vmem>>) attributes {dimension_semantics = [#tpu.dimension_semantics<parallel>], iteration_bounds = array<i64: 1>, scalar_prefetch = 0 : i64, scratch_operands = 0 : i64, tpu.core_type = #tpu.core_type<tc>, window_params = [{transform_indices = @transform_0, window_bounds = array<i64: 8, 256>}, {pipeline_mode = #tpu.pipeline_mode<synchronous>, transform_indices = @transform_1, window_bounds = array<i64: 256, 120>}, {pipeline_mode = #tpu.pipeline_mode<synchronous>, transform_indices = @transform_2, window_bounds = array<i64: 1, 120>}, {pipeline_mode = #tpu.pipeline_mode<synchronous>, transform_indices = @transform_3, window_bounds = array<i64: 120, 84>}, {pipeline_mode = #tpu.pipeline_mode<synchronous>, transform_indices = @transform_4, window_bounds = array<i64: 1, 84>}, {pipeline_mode = #tpu.pipeline_mode<synchronous>, transform_indices = @transform_5, window_bounds = array<i64: 84, 128>}, {pipeline_mode = #tpu.pipeline_mode<synchronous>, transform_indices = @transform_6, window_bounds = array<i64: 1, 128>}, {transform_indices = @transform_7, window_bounds = array<i64: 8, 128>}]} {
    %c0 = arith.constant 0 : index
    %c0_0 = arith.constant 0 : index
    %0 = vector.load %arg1[%c0, %c0_0] : memref<8x256xbf16, #tpu.memory_space<vmem>>, vector<8x256xbf16>
    %c0_1 = arith.constant 0 : index
    %c0_2 = arith.constant 0 : index
    %1 = vector.load %arg2[%c0_1, %c0_2] : memref<256x120xbf16, #tpu.memory_space<vmem>>, vector<256x120xbf16>
    %cst = arith.constant dense<0.000000e+00> : vector<8x120xf32>
    %2 = tpu.matmul %0, %1, %cst {dimension_numbers = #tpu.dot_dimension_numbers<[1], [0], [0], [1], [0, 0, 1, 1], [], []>} : vector<8x256xbf16>, vector<256x120xbf16>, vector<8x120xf32> -> vector<8x120xf32>
    %c0_3 = arith.constant 0 : index
    %c0_4 = arith.constant 0 : index
    %3 = vector.load %arg3[%c0_3, %c0_4] : memref<1x120xf32, #tpu.memory_space<vmem>>, vector<1x120xf32>
    %4 = vector.broadcast %3 : vector<1x120xf32> to vector<8x120xf32>
    %5 = arith.addf %2, %4 : vector<8x120xf32>
    %cst_5 = arith.constant 0.000000e+00 : f32
    %6 = vector.broadcast %cst_5 : f32 to vector<8x120xf32>
    %7 = arith.maximumf %5, %6 : vector<8x120xf32>
    %8 = arith.truncf %7 : vector<8x120xf32> to vector<8x120xbf16>
    %c0_6 = arith.constant 0 : index
    %c0_7 = arith.constant 0 : index
    %9 = vector.load %arg4[%c0_6, %c0_7] : memref<120x84xbf16, #tpu.memory_space<vmem>>, vector<120x84xbf16>
    %cst_8 = arith.constant dense<0.000000e+00> : vector<8x84xf32>
    %10 = tpu.matmul %8, %9, %cst_8 {dimension_numbers = #tpu.dot_dimension_numbers<[1], [0], [0], [1], [0, 0, 1, 1], [], []>} : vector<8x120xbf16>, vector<120x84xbf16>, vector<8x84xf32> -> vector<8x84xf32>
    %c0_9 = arith.constant 0 : index
    %c0_10 = arith.constant 0 : index
    %11 = vector.load %arg5[%c0_9, %c0_10] : memref<1x84xf32, #tpu.memory_space<vmem>>, vector<1x84xf32>
    %12 = vector.broadcast %11 : vector<1x84xf32> to vector<8x84xf32>
    %13 = arith.addf %10, %12 : vector<8x84xf32>
    %cst_11 = arith.constant 0.000000e+00 : f32
    %14 = vector.broadcast %cst_11 : f32 to vector<8x84xf32>
    %15 = arith.maximumf %13, %14 : vector<8x84xf32>
    %16 = arith.truncf %15 : vector<8x84xf32> to vector<8x84xbf16>
    %c0_12 = arith.constant 0 : index
    %c0_13 = arith.constant 0 : index
    %17 = vector.load %arg6[%c0_12, %c0_13] : memref<84x128xbf16, #tpu.memory_space<vmem>>, vector<84x128xbf16>
    %cst_14 = arith.constant dense<0.000000e+00> : vector<8x128xf32>
    %18 = tpu.matmul %16, %17, %cst_14 {dimension_numbers = #tpu.dot_dimension_numbers<[1], [0], [0], [1], [0, 0, 1, 1], [], []>} : vector<8x84xbf16>, vector<84x128xbf16>, vector<8x128xf32> -> vector<8x128xf32>
    %c0_15 = arith.constant 0 : index
    %c0_16 = arith.constant 0 : index
    %19 = vector.load %arg7[%c0_15, %c0_16] : memref<1x128xf32, #tpu.memory_space<vmem>>, vector<1x128xf32>
    %20 = vector.broadcast %19 : vector<1x128xf32> to vector<8x128xf32>
    %21 = arith.addf %18, %20 : vector<8x128xf32>
    %c0_17 = arith.constant 0 : index
    %c0_18 = arith.constant 0 : index
    %22 = vector.load %arg8[%c0_17, %c0_18] : memref<8x128xf32, #tpu.memory_space<vmem>>, vector<8x128xf32>
    tpu.vector_store %arg8[%c0_17, %c0_18], %21 {strides = array<i32>} : memref<8x128xf32, #tpu.memory_space<vmem>>, vector<8x128xf32>,
    return
  }
  func.func @transform_0(%arg0: i32) -> (i32, i32) {
    %c0_i32 = arith.constant 0 : i32
    %c0_i32_0 = arith.constant 0 : i32
    return %arg0, %c0_i32 : i32, i32
  }
  func.func @transform_1(%arg0: i32) -> (i32, i32) {
    %c0_i32 = arith.constant 0 : i32
    %c0_i32_0 = arith.constant 0 : i32
    %c0_i32_1 = arith.constant 0 : i32
    return %c0_i32, %c0_i32_0 : i32, i32
  }
  func.func @transform_2(%arg0: i32) -> (i32, i32) {
    %c0_i32 = arith.constant 0 : i32
    %c0_i32_0 = arith.constant 0 : i32
    %c0_i32_1 = arith.constant 0 : i32
    return %c0_i32, %c0_i32_0 : i32, i32
  }
  func.func @transform_3(%arg0: i32) -> (i32, i32) {
    %c0_i32 = arith.constant 0 : i32
    %c0_i32_0 = arith.constant 0 : i32
    %c0_i32_1 = arith.constant 0 : i32
    return %c0_i32, %c0_i32_0 : i32, i32
  }
  func.func @transform_4(%arg0: i32) -> (i32, i32) {
    %c0_i32 = arith.constant 0 : i32
    %c0_i32_0 = arith.constant 0 : i32
    %c0_i32_1 = arith.constant 0 : i32
    return %c0_i32, %c0_i32_0 : i32, i32
  }
  func.func @transform_5(%arg0: i32) -> (i32, i32) {
    %c0_i32 = arith.constant 0 : i32
    %c0_i32_0 = arith.constant 0 : i32
    %c0_i32_1 = arith.constant 0 : i32
    return %c0_i32, %c0_i32_0 : i32, i32
  }
  func.func @transform_6(%arg0: i32) -> (i32, i32) {
    %c0_i32 = arith.constant 0 : i32
    %c0_i32_0 = arith.constant 0 : i32
    %c0_i32_1 = arith.constant 0 : i32
    return %c0_i32, %c0_i32_0 : i32, i32
  }
  func.func @transform_7(%arg0: i32) -> (i32, i32) {
    %c0_i32 = arith.constant 0 : i32
    %c0_i32_0 = arith.constant 0 : i32
    return %arg0, %c0_i32 : i32, i32
  }
}

</mosaic_0001>

<bundles_post_ra>
// kernel: emnist_forward.3
= control target key start
LH: loop header
LB: loop body
LE: loop exit
PB: predicated region body
PF: predicated region fallthrough
CT: control target
= control target key end

     0   :  { %vm211_vm0 = vcmask 1043456   ;;  %vm212_vm1 = vcmask 1044480   ;;  %vm156_vm2 = vcmask 203776   ;;  %v2267_v1 = vmov 65535   ;;  %s3091_s1 = inlined_call_operand.vmem [shape: bf16[25,6], index: 1, kind: input, shape index: {}]   ;;  %s3092_s0 = inlined_call_operand.vmem [shape: bf16[4,288,25], index: 0, kind: input, shape index: {}]   ;;  %s3093_s2 = inlined_call_operand.vmem [shape: f32[1,6], index: 2, kind: input, shape index: {}]   ;;  %s3094_s3 = inlined_call_operand.vmem [shape: f32[288,6], index: 3, kind: output, shape index: {}]  }
   0x1   :  { %v2193_v0 = vld [vmem:[%s3091_s1] sm:$0xff]   ;;  %v213_v2 = vsel %vm211_vm0, 4294967295, %v2267_v1  ;;  %v2194_v3 = vld [vmem:[%s3091_s1 + $0x8] sm:$0x1f]   ;;  %v2196_v7 = vld [vmem:[%s3092_s0 + $0x90] sm:$0xff]   ;;  %vm1656_vm3 = vcmask 48128  }
   0x2   :  { %2032 = vmatprep.subr.bf16.mxu0 %v2193_v0  ;;  %2072 = vmatprep.subr.bf16.mxu1 %v2193_v0  ;;  %v214_v4 = vsel %vm212_vm1, %v213_v2, 0  ;;  %v2195_v5 = vld [vmem:[%s3092_s0] sm:$0xff]   ;;  %v2197_v8 = vld [vmem:[%s3092_s0 + $0x8] sm:$0xff]   ;;  %v2198_v9 = vld [vmem:[%s3092_s0 + $0x98] sm:$0xff]  }
   0x3   :  { %2033 = vmatpush3.bf16.msra.mxu0 %v2193_v0  ;;  %2073 = vmatpush3.bf16.msra.mxu1 %v2193_v0  ;;  %v216_v6 = vand.u32 %v2194_v3, %v214_v4  ;;  %v2199_v10 = vld [vmem:[%s3092_s0 + $0x10] sm:$0xff]   ;;  %v2200_v11 = vld [vmem:[%s3092_s0 + $0xa0] sm:$0xff]   ;;  %v2201_v12 = vld [vmem:[%s3092_s0 + $0x18] sm:$0xff]  }
   0x4   :  { %2036 = vmatprep.mubr.msk.bf16.mxu0 %vm156_vm2, %v2195_v5  ;;  %2076 = vmatprep.mubr.msk.bf16.mxu1 %vm156_vm2, %v2196_v7  ;;  %v2202_v13 = vld [vmem:[%s3092_s0 + $0xa8] sm:$0xff]   ;;  %v2203_v14 = vld [vmem:[%s3092_s0 + $0x20] sm:$0xff]   ;;  %v2204_v15 = vld [vmem:[%s3092_s0 + $0xb0] sm:$0xff]  }
   0x5   :  { %2034 = vmatprep.subr.bf16.mxu0 %v216_v6  ;;  %2074 = vmatprep.subr.bf16.mxu1 %v216_v6  ;;  %v2205_v16 = vld [vmem:[%s3092_s0 + $0x28] sm:$0xff]   ;;  %v2206_v17 = vld [vmem:[%s3092_s0 + $0xb8] sm:$0xff]   ;;  %v2207_v18 = vld [vmem:[%s3092_s0 + $0x30] sm:$0xff]  }
   0x6   :  { %v2208_v19 = vld [vmem:[%s3092_s0 + $0xc0] sm:$0xff]   ;;  %v2209_v20 = vld [vmem:[%s3092_s0 + $0x38] sm:$0xff]   ;;  %v2210_v21 = vld [vmem:[%s3092_s0 + $0xc8] sm:$0xff]  }
   0x7   :  { %2035 = vmatpush3.bf16.msra.mxu0 %v216_v6  ;;  %2075 = vmatpush3.bf16.msra.mxu1 %v216_v6  ;;  %v2211_v22 = vld [vmem:[%s3092_s0 + $0x40] sm:$0xff]   ;;  %v2212_v23 = vld [vmem:[%s3092_s0 + $0xd0] sm:$0xff]   ;;  %v2213_v24 = vld [vmem:[%s3092_s0 + $0x48] sm:$0xff]  }
   0x8   :  { %2112 = vmatprep.subr.bf16.mxu0 %v2193_v0  ;;  %2152 = vmatprep.subr.bf16.mxu1 %v2193_v0  ;;  %v2214_v25 = vld [vmem:[%s3092_s0 + $0xd8] sm:$0xff]   ;;  %v2215_v26 = vld [vmem:[%s3092_s0 + $0x50] sm:$0xff]   ;;  %v2216_v27 = vld [vmem:[%s3092_s0 + $0xe0] sm:$0xff]  }
   0x9   :  { %v2217_v28 = vld [vmem:[%s3092_s0 + $0x58] sm:$0xff]   ;;  %v2218_v29 = vld [vmem:[%s3092_s0 + $0xe8] sm:$0xff]   ;;  %v2219_v30 = vld [vmem:[%s3092_s0 + $0x60] sm:$0xff]  }
   0xa   :  { %2037 = vmatmul.mubr.msk.bf16.vlgmr.msra.gmra.mrb[0].mxu0 %vm156_vm2, %v2197_v8  ;;  %2077 = vmatmul.mubr.msk.bf16.vlgmr.msra.gmra.mrb[0].mxu1 %vm156_vm2, %v2198_v9  ;;  %v2220_v31 = vld [vmem:[%s3092_s0 + $0xf0] sm:$0xff]   ;;  %v2221_v32 = vld [vmem:[%s3092_s0 + $0x68] sm:$0xff]   ;;  %v2222_v33 = vld [vmem:[%s3092_s0 + $0xf8] sm:$0xff]  }
   0xb   :  { %2113 = vmatpush3.bf16.msra.mxu0 %v2193_v0  ;;  %2153 = vmatpush3.bf16.msra.mxu1 %v2193_v0  ;;  %v2223_v34 = vld [vmem:[%s3092_s0 + $0x70] sm:$0xff]   ;;  %v2224_v35 = vld [vmem:[%s3092_s0 + $0x100] sm:$0xff]   ;;  %v2225_v36 = vld [vmem:[%s3092_s0 + $0x78] sm:$0xff]  }
   0xc   :  { %2040 = vmatprep.mubr.msk.bf16.mxu0 %vm156_vm2, %v2199_v10  ;;  %2080 = vmatprep.mubr.msk.bf16.mxu1 %vm156_vm2, %v2200_v11  ;;  %v2226_v37 = vld [vmem:[%s3092_s0 + $0x108] sm:$0xff]   ;;  %v2227_v38 = vld [vmem:[%s3092_s0 + $0x80] sm:$0xff]   ;;  %v2228_v39 = vld [vmem:[%s3092_s0 + $0x110] sm:$0xff]  }
   0xd   :  { %2114 = vmatprep.subr.bf16.mxu0 %v216_v6  ;;  %2154 = vmatprep.subr.bf16.mxu1 %v216_v6  ;;  %v2229_v40 = vld [vmem:[%s3092_s0 + $0x88] sm:$0xff]   ;;  %v2230_v41 = vld [vmem:[%s3092_s0 + $0x118] sm:$0xff]   ;;  %v2231_v42 = vld [vmem:[%s3092_s0 + $0x120] sm:$0xff]  }
   0xe   :  { %v2232_v43 = vld [vmem:[%s3092_s0 + $0x1b0] sm:$0xff]   ;;  %v2233_v44 = vld [vmem:[%s3092_s0 + $0x128] sm:$0xff]   ;;  %v2234_v45 = vld [vmem:[%s3092_s0 + $0x1b8] sm:$0xff]  }
   0xf   :  { %2115 = vmatpush3.bf16.msra.mxu0 %v216_v6  ;;  %2155 = vmatpush3.bf16.msra.mxu1 %v216_v6  ;;  %v2235_v46 = vld [vmem:[%s3092_s0 + $0x130] sm:$0xff]   ;;  %v2236_v47 = vld [vmem:[%s3092_s0 + $0x1c0] sm:$0xff]   ;;  %v2237_v48 = vld [vmem:[%s3092_s0 + $0x138] sm:$0xff]  }
  0x10   :  { %v2238_v49 = vld [vmem:[%s3092_s0 + $0x1c8] sm:$0xff]   ;;  %v2239_v50 = vld [vmem:[%s3092_s0 + $0x140] sm:$0xff]   ;;  %v2240_v51 = vld [vmem:[%s3092_s0 + $0x1d0] sm:$0xff]  }
  0x11   :  { %v2241_v52 = vld [vmem:[%s3092_s0 + $0x148] sm:$0xff]   ;;  %v2242_v53 = vld [vmem:[%s3092_s0 + $0x1d8] sm:$0xff]   ;;  %v2243_v54 = vld [vmem:[%s3092_s0 + $0x150] sm:$0xff]  }
  0x12   :  { %2041 = vmatmul.mubr.msk.bf16.gmra.mrb[4].mxu0 %vm156_vm2, %v2201_v12  ;;  %2081 = vmatmul.mubr.msk.bf16.gmra.mrb[4].mxu1 %vm156_vm2, %v2202_v13  ;;  %v2244_v55 = vld [vmem:[%s3092_s0 + $0x1e0] sm:$0xff]   ;;  %v2245_v56 = vld [vmem:[%s3092_s0 + $0x158] sm:$0xff]   ;;  %v2246_v57 = vld [vmem:[%s3092_s0 + $0x1e8] sm:$0xff]  }
  0x13   :  { %2044 = vmatprep.mubr.msk.bf16.mxu0 %vm156_vm2, %v2203_v14  ;;  %2084 = vmatprep.mubr.msk.bf16.mxu1 %vm156_vm2, %v2204_v15  ;;  %v2247_v58 = vld [vmem:[%s3092_s0 + $0x160] sm:$0xff]   ;;  %v2248_v59 = vld [vmem:[%s3092_s0 + $0x1f0] sm:$0xff]   ;;  %v2249_v60 = vld [vmem:[%s3092_s0 + $0x168] sm:$0xff]  }
  0x14   :  { %v2250_v61 = vld [vmem:[%s3092_s0 + $0x1f8] sm:$0xff]   ;;  %v2251_v62 = vld [vmem:[%s3092_s0 + $0x170] sm:$0xff]   ;;  %v2252_v63 = vld [vmem:[%s3092_s0 + $0x200] sm:$0xff]  }
  0x15   :  { %v2253_v0 = vld [vmem:[%s3092_s0 + $0x178] sm:$0xff]   ;;  %v2254_v1 = vld [vmem:[%s3092_s0 + $0x208] sm:$0xff]   ;;  %v2255_v2 = vld [vmem:[%s3092_s0 + $0x180] sm:$0xff]  }
  0x16   :  { %v2256_v3 = vld [vmem:[%s3092_s0 + $0x210] sm:$0xff]   ;;  %v2257_v4 = vld [vmem:[%s3092_s0 + $0x188] sm:$0xff]   ;;  %v2258_v5 = vld [vmem:[%s3092_s0 + $0x218] sm:$0xff]  }
  0x17   :  { %v2259_v6 = vld [vmem:[%s3092_s0 + $0x190] sm:$0xff]   ;;  %v2260_v7 = vld [vmem:[%s3092_s0 + $0x220] sm:$0xff]   ;;  %v2261_v8 = vld [vmem:[%s3092_s0 + $0x198] sm:$0xff]  }
  0x18   :  { %v2262_v9 = vld [vmem:[%s3092_s0 + $0x228] sm:$0xff]   ;;  %v2263_v10 = vld [vmem:[%s3092_s0 + $0x1a0] sm:$0xff]   ;;  %v2264_v11 = vld [vmem:[%s3092_s0 + $0x230] sm:$0xff]  }
  0x19   :  { %v2265_v12 = vld [vmem:[%s3092_s0 + $0x1a8] sm:$0xff]   ;;  %v2266_v13 = vld [vmem:[%s3092_s0 + $0x238] sm:$0xff]  }
  0x1a   :  { %2045 = vmatmul.mubr.msk.bf16.gmra.mrb[8].mxu0 %vm156_vm2, %v2205_v16  ;;  %2085 = vmatmul.mubr.msk.bf16.gmra.mrb[8].mxu1 %vm156_vm2, %v2206_v17 }
  0x1b   :  { %2048 = vmatprep.mubr.msk.bf16.mxu0 %vm156_vm2, %v2207_v18  ;;  %2088 = vmatprep.mubr.msk.bf16.mxu1 %vm156_vm2, %v2208_v19 }
  0x22   :  { %2049 = vmatmul.mubr.msk.bf16.gmra.mrb[12].mxu0 %vm156_vm2, %v2209_v20  ;;  %2089 = vmatmul.mubr.msk.bf16.gmra.mrb[12].mxu1 %vm156_vm2, %v2210_v21 }
  0x23   :  { %2052 = vmatprep.mubr.msk.bf16.mxu0 %vm156_vm2, %v2211_v22  ;;  %2092 = vmatprep.mubr.msk.bf16.mxu1 %vm156_vm2, %v2212_v23 }
  0x2a   :  { %2053 = vmatmul.mubr.msk.bf16.gmra.mrb[16].mxu0 %vm156_vm2, %v2213_v24  ;;  %2093 = vmatmul.mubr.msk.bf16.gmra.mrb[16].mxu1 %vm156_vm2, %v2214_v25 }
  0x2b   :  { %2056 = vmatprep.mubr.msk.bf16.mxu0 %vm156_vm2, %v2215_v26  ;;  %2096 = vmatprep.mubr.msk.bf16.mxu1 %vm156_vm2, %v2216_v27 }
  0x32   :  { %2057 = vmatmul.mubr.msk.bf16.gmra.mrb[20].mxu0 %vm156_vm2, %v2217_v28  ;;  %2097 = vmatmul.mubr.msk.bf16.gmra.mrb[20].mxu1 %vm156_vm2, %v2218_v29 }
  0x33   :  { %2060 = vmatprep.mubr.msk.bf16.mxu0 %vm156_vm2, %v2219_v30  ;;  %2100 = vmatprep.mubr.msk.bf16.mxu1 %vm156_vm2, %v2220_v31 }
  0x3a   :  { %2061 = vmatmul.mubr.msk.bf16.gmra.mrb[24].mxu0 %vm156_vm2, %v2221_v32  ;;  %2101 = vmatmul.mubr.msk.bf16.gmra.mrb[24].mxu1 %vm156_vm2, %v2222_v33 }
  0x3b   :  { %2064 = vmatprep.mubr.msk.bf16.mxu0 %vm156_vm2, %v2223_v34  ;;  %2104 = vmatprep.mubr.msk.bf16.mxu1 %vm156_vm2, %v2224_v35 }
  0x42   :  { %2065 = vmatmul.mubr.msk.bf16.gmra.mrb[28].mxu0 %vm156_vm2, %v2225_v36  ;;  %2105 = vmatmul.mubr.msk.bf16.gmra.mrb[28].mxu1 %vm156_vm2, %v2226_v37 }
  0x43   :  { %2068 = vmatprep.mubr.msk.bf16.mxu0 %vm156_vm2, %v2227_v38  ;;  %2108 = vmatprep.mubr.msk.bf16.mxu1 %vm156_vm2, %v2228_v39 }
  0x4a   :  { %2069 = vmatmul.mubr.msk.bf16.gmra.mrb[32].mxu0 %vm156_vm2, %v2229_v40  ;;  %2109 = vmatmul.mubr.msk.bf16.gmra.mrb[32].mxu1 %vm156_vm2, %v2230_v41 }
  0x4b   :  { %2116 = vmatprep.mubr.msk.bf16.mxu0 %vm156_vm2, %v2231_v42  ;;  %2156 = vmatprep.mubr.msk.bf16.mxu1 %vm156_vm2, %v2232_v43 }
  0x52   :  { %2117 = vmatmul.mubr.msk.bf16.vlgmr.msra.gmra.mrb[36].mxu0 %vm156_vm2, %v2233_v44  ;;  %2157 = vmatmul.mubr.msk.bf16.vlgmr.msra.gmra.mrb[36].mxu1 %vm156_vm2, %v2234_v45 }
  0x53   :  { %2120 = vmatprep.mubr.msk.bf16.mxu0 %vm156_vm2, %v2235_v46  ;;  %2160 = vmatprep.mubr.msk.bf16.mxu1 %vm156_vm2, %v2236_v47 }
  0x5a   :  { %2121 = vmatmul.mubr.msk.bf16.gmra.mrb[40].mxu0 %vm156_vm2, %v2237_v48  ;;  %2161 = vmatmul.mubr.msk.bf16.gmra.mrb[40].mxu1 %vm156_vm2, %v2238_v49 }
  0x5b   :  { %2124 = vmatprep.mubr.msk.bf16.mxu0 %vm156_vm2, %v2239_v50  ;;  %2164 = vmatprep.mubr.msk.bf16.mxu1 %vm156_vm2, %v2240_v51 }
  0x62   :  { %2125 = vmatmul.mubr.msk.bf16.gmra.mrb[44].mxu0 %vm156_vm2, %v2241_v52  ;;  %2165 = vmatmul.mubr.msk.bf16.gmra.mrb[44].mxu1 %vm156_vm2, %v2242_v53 }
  0x63   :  { %2128 = vmatprep.mubr.msk.bf16.mxu0 %vm156_vm2, %v2243_v54  ;;  %2168 = vmatprep.mubr.msk.bf16.mxu1 %vm156_vm2, %v2244_v55 }
  0x6a   :  { %2129 = vmatmul.mubr.msk.bf16.gmra.mrb[48].mxu0 %vm156_vm2, %v2245_v56  ;;  %2169 = vmatmul.mubr.msk.bf16.gmra.mrb[48].mxu1 %vm156_vm2, %v2246_v57 }
  0x6b   :  { %2132 = vmatprep.mubr.msk.bf16.mxu0 %vm156_vm2, %v2247_v58  ;;  %2172 = vmatprep.mubr.msk.bf16.mxu1 %vm156_vm2, %v2248_v59 }
  0x72   :  { %2133 = vmatmul.mubr.msk.bf16.gmra.mrb[52].mxu0 %vm156_vm2, %v2249_v60  ;;  %2173 = vmatmul.mubr.msk.bf16.gmra.mrb[52].mxu1 %vm156_vm2, %v2250_v61 }
  0x73   :  { %2136 = vmatprep.mubr.msk.bf16.mxu0 %vm156_vm2, %v2251_v62  ;;  %2176 = vmatprep.mubr.msk.bf16.mxu1 %vm156_vm2, %v2252_v63 }
  0x7a   :  { %2137 = vmatmul.mubr.msk.bf16.gmra.mrb[56].mxu0 %vm156_vm2, %v2253_v0  ;;  %2177 = vmatmul.mubr.msk.bf16.gmra.mrb[56].mxu1 %vm156_vm2, %v2254_v1 }
  0x7b   :  { %2140 = vmatprep.mubr.msk.bf16.mxu0 %vm156_vm2, %v2255_v2  ;;  %2180 = vmatprep.mubr.msk.bf16.mxu1 %vm156_vm2, %v2256_v3 }
  0x82   :  { %2141 = vmatmul.mubr.msk.bf16.gmra.mrb[60].mxu0 %vm156_vm2, %v2257_v4  ;;  %2181 = vmatmul.mubr.msk.bf16.gmra.mrb[60].mxu1 %vm156_vm2, %v2258_v5 }
  0x83   :  { %2144 = vmatprep.mubr.msk.bf16.mxu0 %vm156_vm2, %v2259_v6  ;;  %2184 = vmatprep.mubr.msk.bf16.mxu1 %vm156_vm2, %v2260_v7 }
  0x8a   :  { %2145 = vmatmul.mubr.msk.bf16.gmra.mrb[64].mxu0 %vm156_vm2, %v2261_v8  ;;  %2185 = vmatmul.mubr.msk.bf16.gmra.mrb[64].mxu1 %vm156_vm2, %v2262_v9 }
  0x8b   :  { %2148 = vmatprep.mubr.msk.bf16.mxu0 %vm156_vm2, %v2263_v10  ;;  %2188 = vmatprep.mubr.msk.bf16.mxu1 %vm156_vm2, %v2264_v11 }
  0x92   :  { %2149 = vmatmul.mubr.msk.bf16.gmra.mrb[68].mxu0 %vm156_vm2, %v2265_v12  ;;  %2189 = vmatmul.mubr.msk.bf16.gmra.mrb[68].mxu1 %vm156_vm2, %v2266_v13 }
  0xdd   :  { %v2582_v14 = vpop.f32.mrb[0].mxu0  ;;  %v2584_v15 = vpop.f32.mrb[0].mxu1 }
  0xde   :  { %v2588_v17 = vpop.f32.mrb[1].mxu0  ;;  %v2590_v18 = vpop.f32.mrb[1].mxu1 }
  0xdf   :  { %v2594_v20 = vpop.f32.mrb[2].mxu0  ;;  %v2596_v21 = vpop.f32.mrb[2].mxu1  ;;  %v3146_v9 = vmax.f32 %v2588_v17, %v2590_v18 }
  0xe0   :  { %v2600_v23 = vpop.f32.mrb[3].mxu0  ;;  %v2602_v24 = vpop.f32.mrb[3].mxu1 }
  0xe5   :  { %v2606_v26 = vpop.f32.mrb[4].mxu0  ;;  %v2608_v27 = vpop.f32.mrb[4].mxu1 }
  0xe6   :  { %v2612_v29 = vpop.f32.mrb[5].mxu0  ;;  %v2614_v30 = vpop.f32.mrb[5].mxu1 }
  0xe7   :  { %v2618_v32 = vpop.f32.mrb[6].mxu0  ;;  %v2620_v33 = vpop.f32.mrb[6].mxu1 }
  0xe8   :  { %v2624_v35 = vpop.f32.mrb[7].mxu0  ;;  %v2626_v36 = vpop.f32.mrb[7].mxu1 }
  0xed   :  { %v2630_v38 = vpop.f32.mrb[8].mxu0  ;;  %v2632_v39 = vpop.f32.mrb[8].mxu1 }
  0xee   :  { %v2636_v41 = vpop.f32.mrb[9].mxu0  ;;  %v2638_v42 = vpop.f32.mrb[9].mxu1 }
  0xef   :  { %v2642_v44 = vpop.f32.mrb[10].mxu0  ;;  %v2644_v45 = vpop.f32.mrb[10].mxu1 }
  0xf0   :  { %v2648_v47 = vpop.f32.mrb[11].mxu0  ;;  %v2650_v48 = vpop.f32.mrb[11].mxu1 }
  0xf5   :  { %v2654_v50 = vpop.f32.mrb[12].mxu0  ;;  %v2656_v51 = vpop.f32.mrb[12].mxu1 }
  0xf6   :  { %v2660_v53 = vpop.f32.mrb[13].mxu0  ;;  %v2662_v54 = vpop.f32.mrb[13].mxu1 }
  0xf7   :  { %v2666_v56 = vpop.f32.mrb[14].mxu0  ;;  %v2668_v57 = vpop.f32.mrb[14].mxu1 }
  0xf8   :  { %v2672_v59 = vpop.f32.mrb[15].mxu0  ;;  %v2674_v60 = vpop.f32.mrb[15].mxu1 }
  0xfd   :  { %v2678_v62 = vpop.f32.mrb[16].mxu0  ;;  %v2680_v63 = vpop.f32.mrb[16].mxu1 }
  0xfe   :  { %v2684_v1 = vpop.f32.mrb[17].mxu0  ;;  %v2686_v2 = vpop.f32.mrb[17].mxu1 }
  0xff   :  { %v2690_v4 = vpop.f32.mrb[18].mxu0  ;;  %v2692_v5 = vpop.f32.mrb[18].mxu1 }
 0x100   :  { %v2696_v7 = vpop.f32.mrb[19].mxu0  ;;  %v2698_v8 = vpop.f32.mrb[19].mxu1 }
 0x105   :  { %v2702_v10 = vpop.f32.mrb[20].mxu0  ;;  %v2704_v11 = vpop.f32.mrb[20].mxu1 }
 0x106   :  { %v2708_v13 = vpop.f32.mrb[21].mxu0  ;;  %v2710_v3 = vpop.f32.mrb[21].mxu1 }
 0x107   :  { %v2714_v0 = vpop.f32.mrb[22].mxu0  ;;  %v2716_v61 = vpop.f32.mrb[22].mxu1 }
 0x108   :  { %v2720_v58 = vpop.f32.mrb[23].mxu0  ;;  %v2722_v55 = vpop.f32.mrb[23].mxu1 }
 0x109   :  { %3120 = vst [vmem:[#allocation2_spill] sm:$0xff] %v2722_v55 }
 0x10d   :  { %v2726_v52 = vpop.f32.mrb[24].mxu0  ;;  %v2728_v49 = vpop.f32.mrb[24].mxu1 }
 0x10e   :  { %3121 = vst [vmem:[#allocation3_spill] sm:$0xff] %v2726_v52  ;;  %3122 = vst [vmem:[#allocation4_spill] sm:$0xff] %v2728_v49  ;;  %v2732_v46 = vpop.f32.mrb[25].mxu0  ;;  %v2734_v43 = vpop.f32.mrb[25].mxu1 }
 0x10f   :  { %3123 = vst [vmem:[#allocation5_spill] sm:$0xff] %v2732_v46  ;;  %3124 = vst [vmem:[#allocation6_spill] sm:$0xff] %v2734_v43  ;;  %v2738_v40 = vpop.f32.mrb[26].mxu0  ;;  %v2740_v37 = vpop.f32.mrb[26].mxu1  ;;  %v2804_v43 = vld [vmem:[%s3093_s2] ss:$0 sm:$0xff] }
 0x110   :  { %3125 = vst [vmem:[#allocation7_spill] sm:$0xff] %v2738_v40  ;;  %3126 = vst [vmem:[#allocation8_spill] sm:$0xff] %v2740_v37  ;;  %v2744_v34 = vpop.f32.mrb[27].mxu0  ;;  %v2746_v31 = vpop.f32.mrb[27].mxu1  ;;  %v3145_v40 = vmax.f32 %v2582_v14, %v2584_v15 }
 0x111   :  { %3127 = vst [vmem:[#allocation9_spill] sm:$0xff] %v2744_v34  ;;  %3128 = vst [vmem:[#allocation10_spill] sm:$0xff] %v2746_v31 }
 0x115   :  { %v2750_v28 = vpop.f32.mrb[28].mxu0  ;;  %v2752_v25 = vpop.f32.mrb[28].mxu1 }
 0x116   :  { %3129 = vst [vmem:[#allocation11_spill] sm:$0xff] %v2750_v28  ;;  %3130 = vst [vmem:[#allocation12_spill] sm:$0xff] %v2752_v25  ;;  %v2756_v22 = vpop.f32.mrb[29].mxu0  ;;  %v2758_v19 = vpop.f32.mrb[29].mxu1 }
 0x117   :  { %3131 = vst [vmem:[#allocation13_spill] sm:$0xff] %v2756_v22  ;;  %3132 = vst [vmem:[#allocation14_spill] sm:$0xff] %v2758_v19  ;;  %v2762_v16 = vpop.f32.mrb[30].mxu0  ;;  %v2764_v37 = vpop.f32.mrb[30].mxu1 }
 0x118   :  { %3133 = vst [vmem:[#allocation15_spill] sm:$0xff] %v2762_v16  ;;  %3134 = vst [vmem:[#allocation16_spill] sm:$0xff] %v2764_v37  ;;  %v2768_v31 = vpop.f32.mrb[31].mxu0  ;;  %v2770_v34 = vpop.f32.mrb[31].mxu1 }
 0x119   :  { %3135 = vst [vmem:[#allocation17_spill] sm:$0xff] %v2768_v31  ;;  %3136 = vst [vmem:[#allocation18_spill] sm:$0xff] %v2770_v34 }
 0x11d   :  { %v2774_v25 = vpop.f32.mrb[32].mxu0  ;;  %v2776_v28 = vpop.f32.mrb[32].mxu1 }
 0x11e   :  { %3137 = vst [vmem:[#allocation19_spill] sm:$0xff] %v2774_v25  ;;  %3138 = vst [vmem:[#allocation20_spill] sm:$0xff] %v2776_v28  ;;  %v2780_v19 = vpop.f32.mrb[33].mxu0  ;;  %v2782_v22 = vpop.f32.mrb[33].mxu1 }
 0x11f   :  { %3139 = vst [vmem:[#allocation21_spill] sm:$0xff] %v2780_v19  ;;  %3140 = vst [vmem:[#allocation22_spill] sm:$0xff] %v2782_v22  ;;  %v2786_v37 = vpop.f32.mrb[34].mxu0  ;;  %v2788_v16 = vpop.f32.mrb[34].mxu1 }
 0x120   :  { %3141 = vst [vmem:[#allocation23_spill] sm:$0xff] %v2786_v37  ;;  %3142 = vst [vmem:[#allocation24_spill] sm:$0xff] %v2788_v16  ;;  %v2792_v34 = vpop.f32.mrb[35].mxu0  ;;  %v2794_v31 = vpop.f32.mrb[35].mxu1 }
 0x121   :  { %3143 = vst [vmem:[#allocation25_spill] sm:$0xff] %v2792_v34  ;;  %3144 = vst [vmem:[#allocation26_spill] sm:$0xff] %v2794_v31  ;;  %v3147_v31 = vmax.f32 %v2594_v20, %v2596_v21 }
 0x125   :  { %v2118_v28 = vpop.f32.mrb[36].mxu0  ;;  %v2158_v25 = vpop.f32.mrb[36].mxu1 }
 0x126   :  { %v1149_v6 = vmax.f32 %v3145_v40, %v2118_v28  ;;  %v1004_v22 = vpop.f32.mrb[37].mxu0  ;;  %v1398_v19 = vpop.f32.mrb[37].mxu1  ;;  %v3148_v40 = vmax.f32 %v2600_v23, %v2602_v24 }
 0x127   :  { %v1147_v16 = vmax.f32 %v3146_v9, %v1004_v22  ;;  %v2119_v37 = vpop.f32.mrb[38].mxu0  ;;  %v2159_v46 = vpop.f32.mrb[38].mxu1 }
 0x128   :  { %v1543_v12 = vmax.f32 %v1149_v6, %v2158_v25  ;;  %v1150_v34 = vmax.f32 %v3147_v31, %v2119_v37  ;;  %v1007_v14 = vpop.f32.mrb[39].mxu0  ;;  %v1401_v15 = vpop.f32.mrb[39].mxu1 }
 0x129   :  { %v1541_v28 = vmax.f32 %v1147_v16, %v1398_v19  ;;  %v1148_v49 = vmax.f32 %v3148_v40, %v1007_v14  ;;  %v3149_v19 = vmax.f32 %v2606_v26, %v2608_v27  ;;  %v3151_v27 = vmax.f32 %v2618_v32, %v2620_v33 }
 0x12a   :  { %v1586_v52 = vadd.f32 %v2804_v43, %v1543_v12  ;;  %v1544_v55 = vmax.f32 %v1150_v34, %v2159_v46  ;;  %v3150_v46 = vmax.f32 %v2612_v29, %v2614_v30  ;;  %v3152_v30 = vmax.f32 %v2624_v35, %v2626_v36 }
 0x12b   :  { %v1584_v17 = vadd.f32 %v2804_v43, %v1541_v28  ;;  %v1542_v18 = vmax.f32 %v1148_v49, %v1401_v15  ;;  %v3153_v36 = vmax.f32 %v2630_v38, %v2632_v39  ;;  %v3155_v39 = vmax.f32 %v2642_v44, %v2644_v45 }
 0x12c   :  { %v1622_v22 = vmax.f32 %v1586_v52, 0.0  ;;  %v1587_v25 = vadd.f32 %v2804_v43, %v1544_v55 }
 0x12d   :  { %v1620_v6 = vmax.f32 %v1584_v17, 0.0  ;;  %v1585_v20 = vadd.f32 %v2804_v43, %v1542_v18  ;;  %v2122_v21 = vpop.f32.mrb[40].mxu0  ;;  %v2162_v31 = vpop.f32.mrb[40].mxu1 }
 0x12e   :  { %1659 = vst.msk [vmem:[%s3094_s3 + $0x10] sm:$0xff] %vm1656_vm3, %v1622_v22  ;;  %v1623_v16 = vmax.f32 %v1587_v25, 0.0  ;;  %v1153_v23 = vmax.f32 %v3149_v19, %v2122_v21  ;;  %v1020_v24 = vpop.f32.mrb[41].mxu0  ;;  %v1414_v34 = vpop.f32.mrb[41].mxu1 }
 0x12f   :  { %1657 = vst.msk [vmem:[%s3094_s3] sm:$0xff] %vm1656_vm3, %v1620_v6  ;;  %v1621_v37 = vmax.f32 %v1585_v20, 0.0  ;;  %v1151_v49 = vmax.f32 %v3150_v46, %v1020_v24  ;;  %v2123_v52 = vpop.f32.mrb[42].mxu0  ;;  %v2163_v55 = vpop.f32.mrb[42].mxu1 }
 0x130   :  { %1660 = vst.msk [vmem:[%s3094_s3 + $0x18] sm:$0xff] %vm1656_vm3, %v1623_v16  ;;  %v1547_v26 = vmax.f32 %v1153_v23, %v2162_v31  ;;  %v1154_v9 = vmax.f32 %v3151_v27, %v2123_v52  ;;  %v1023_v12 = vpop.f32.mrb[43].mxu0  ;;  %v1417_v14 = vpop.f32.mrb[43].mxu1  ;;  %v3154_v23 = vmax.f32 %v2636_v41, %v2638_v42  ;;  %v3156_v42 = vmax.f32 %v2648_v47, %v2650_v48 }
 0x131   :  { %1658 = vst.msk [vmem:[%s3094_s3 + $0x8] sm:$0xff] %vm1656_vm3, %v1621_v37  ;;  %v1545_v29 = vmax.f32 %v1151_v49, %v1414_v34  ;;  %v1152_v15 = vmax.f32 %v3152_v30, %v1023_v12  ;;  %v3157_v48 = vmax.f32 %v2654_v50, %v2656_v51  ;;  %v3159_v51 = vmax.f32 %v2666_v56, %v2668_v57 }
 0x132   :  { %v1590_v28 = vadd.f32 %v2804_v43, %v1547_v26  ;;  %v1548_v40 = vmax.f32 %v1154_v9, %v2163_v55 }
 0x133   :  { %v1588_v17 = vadd.f32 %v2804_v43, %v1545_v29  ;;  %v1546_v18 = vmax.f32 %v1152_v15, %v1417_v14 }
 0x134   :  { %v1626_v32 = vmax.f32 %v1590_v28, 0.0  ;;  %v1591_v33 = vadd.f32 %v2804_v43, %v1548_v40 }
 0x135   :  { %v1624_v22 = vmax.f32 %v1588_v17, 0.0  ;;  %v1589_v25 = vadd.f32 %v2804_v43, %v1546_v18  ;;  %v2126_v6 = vpop.f32.mrb[44].mxu0  ;;  %v2166_v20 = vpop.f32.mrb[44].mxu1 }
 0x136   :  { %1663 = vst.msk [vmem:[%s3094_s3 + $0x30] sm:$0xff] %vm1656_vm3, %v1626_v32  ;;  %v1627_v35 = vmax.f32 %v1591_v33, 0.0  ;;  %v1157_v21 = vmax.f32 %v3153_v36, %v2126_v6  ;;  %v1036_v31 = vpop.f32.mrb[45].mxu0  ;;  %v1430_v16 = vpop.f32.mrb[45].mxu1  ;;  %v3158_v32 = vmax.f32 %v2660_v53, %v2662_v54  ;;  %v3160_v54 = vmax.f32 %v2672_v59, %v2674_v60 }
 0x137   :  { %1661 = vst.msk [vmem:[%s3094_s3 + $0x20] sm:$0xff] %vm1656_vm3, %v1624_v22  ;;  %v1625_v19 = vmax.f32 %v1589_v25, 0.0  ;;  %v1155_v24 = vmax.f32 %v3154_v23, %v1036_v31  ;;  %v2127_v34 = vpop.f32.mrb[46].mxu0  ;;  %v2167_v37 = vpop.f32.mrb[46].mxu1  ;;  %v3161_v60 = vmax.f32 %v2678_v62, %v2680_v63  ;;  %v3163_v63 = vmax.f32 %v2690_v4, %v2692_v5 }
 0x138   :  { %1664 = vst.msk [vmem:[%s3094_s3 + $0x38] sm:$0xff] %vm1656_vm3, %v1627_v35  ;;  %v1551_v38 = vmax.f32 %v1157_v21, %v2166_v20  ;;  %v1158_v46 = vmax.f32 %v3155_v39, %v2127_v34  ;;  %v1039_v49 = vpop.f32.mrb[47].mxu0  ;;  %v1433_v52 = vpop.f32.mrb[47].mxu1 }
 0x139   :  { %1662 = vst.msk [vmem:[%s3094_s3 + $0x28] sm:$0xff] %vm1656_vm3, %v1625_v19  ;;  %v1549_v41 = vmax.f32 %v1155_v24, %v1430_v16  ;;  %v1156_v55 = vmax.f32 %v3156_v42, %v1039_v49 }
 0x13a   :  { %v1594_v26 = vadd.f32 %v2804_v43, %v1551_v38  ;;  %v1552_v27 = vmax.f32 %v1158_v46, %v2167_v37 }
 0x13b   :  { %v1592_v9 = vadd.f32 %v2804_v43, %v1549_v41  ;;  %v1550_v12 = vmax.f32 %v1156_v55, %v1433_v52  ;;  %v3162_v52 = vmax.f32 %v2684_v1, %v2686_v2  ;;  %v3164_v2 = vmax.f32 %v2696_v7, %v2698_v8 }
 0x13c   :  { %v1630_v44 = vmax.f32 %v1594_v26, 0.0  ;;  %v1595_v45 = vadd.f32 %v2804_v43, %v1552_v27  ;;  %v3165_v8 = vmax.f32 %v2702_v10, %v2704_v11  ;;  %v3167_v11 = vmax.f32 %v2714_v0, %v2716_v61 }
 0x13d   :  { %v1628_v14 = vmax.f32 %v1592_v9, 0.0  ;;  %v1593_v29 = vadd.f32 %v2804_v43, %v1550_v12  ;;  %v2130_v30 = vpop.f32.mrb[48].mxu0  ;;  %v2170_v15 = vpop.f32.mrb[48].mxu1 }
 0x13e   :  { %1667 = vst.msk [vmem:[%s3094_s3 + $0x50] sm:$0xff] %vm1656_vm3, %v1630_v44  ;;  %v1631_v47 = vmax.f32 %v1595_v45, 0.0  ;;  %v1161_v28 = vmax.f32 %v3157_v48, %v2130_v30  ;;  %v1052_v40 = vpop.f32.mrb[49].mxu0  ;;  %v1446_v17 = vpop.f32.mrb[49].mxu1 }
 0x13f   :  { %1665 = vst.msk [vmem:[%s3094_s3 + $0x40] sm:$0xff] %vm1656_vm3, %v1628_v14  ;;  %v1629_v18 = vmax.f32 %v1593_v29, 0.0  ;;  %v1159_v33 = vmax.f32 %v3158_v32, %v1052_v40  ;;  %v2131_v22 = vpop.f32.mrb[50].mxu0  ;;  %v2171_v25 = vpop.f32.mrb[50].mxu1  ;;  %v3166_v32 = vmax.f32 %v2708_v13, %v2710_v3  ;;  %v3168_v13 = vld [vmem:[#allocation2_spill] sm:$0xff] }
 0x140   :  { %1668 = vst.msk [vmem:[%s3094_s3 + $0x58] sm:$0xff] %vm1656_vm3, %v1631_v47  ;;  %v1555_v50 = vmax.f32 %v1161_v28, %v2170_v15  ;;  %v1162_v6 = vmax.f32 %v3159_v51, %v2131_v22  ;;  %v1055_v20 = vpop.f32.mrb[51].mxu0  ;;  %v1449_v35 = vpop.f32.mrb[51].mxu1 }
 0x141   :  { %1666 = vst.msk [vmem:[%s3094_s3 + $0x48] sm:$0xff] %vm1656_vm3, %v1629_v18  ;;  %v1553_v53 = vmax.f32 %v1159_v33, %v1446_v17  ;;  %v1160_v36 = vmax.f32 %v3160_v54, %v1055_v20  ;;  %v3169_v20 = vmax.f32 %v2720_v58, %v3168_v13 }
 0x142   :  { %v1598_v21 = vadd.f32 %v2804_v43, %v1555_v50  ;;  %v1556_v31 = vmax.f32 %v1162_v6, %v2171_v25 }
 0x143   :  { %v1596_v16 = vadd.f32 %v2804_v43, %v1553_v53  ;;  %v1554_v19 = vmax.f32 %v1160_v36, %v1449_v35 }
 0x144   :  { %v1634_v56 = vmax.f32 %v1598_v21, 0.0  ;;  %v1599_v57 = vadd.f32 %v2804_v43, %v1556_v31 }
 0x145   :  { %v1632_v23 = vmax.f32 %v1596_v16, 0.0  ;;  %v1597_v24 = vadd.f32 %v2804_v43, %v1554_v19  ;;  %v2134_v34 = vpop.f32.mrb[52].mxu0  ;;  %v2174_v37 = vpop.f32.mrb[52].mxu1 }
 0x146   :  { %1671 = vst.msk [vmem:[%s3094_s3 + $0x70] sm:$0xff] %vm1656_vm3, %v1634_v56  ;;  %v1635_v59 = vmax.f32 %v1599_v57, 0.0  ;;  %v1165_v38 = vmax.f32 %v3161_v60, %v2134_v34  ;;  %v1068_v39 = vpop.f32.mrb[53].mxu0  ;;  %v1462_v46 = vpop.f32.mrb[53].mxu1  ;;  %v3170_v57 = vld [vmem:[#allocation3_spill] sm:$0xff] }
 0x147   :  { %1669 = vst.msk [vmem:[%s3094_s3 + $0x60] sm:$0xff] %vm1656_vm3, %v1632_v23  ;;  %v1633_v49 = vmax.f32 %v1597_v24, 0.0  ;;  %v1163_v41 = vmax.f32 %v3162_v52, %v1068_v39  ;;  %v2135_v42 = vpop.f32.mrb[54].mxu0  ;;  %v2175_v55 = vpop.f32.mrb[54].mxu1  ;;  %v3171_v23 = vld [vmem:[#allocation4_spill] sm:$0xff]  ;;  %v3174_v39 = vld [vmem:[#allocation6_spill] sm:$0xff] }
 0x148   :  { %1672 = vst.msk [vmem:[%s3094_s3 + $0x78] sm:$0xff] %vm1656_vm3, %v1635_v59  ;;  %v1559_v62 = vmax.f32 %v1165_v38, %v2174_v37  ;;  %v1166_v26 = vmax.f32 %v3163_v63, %v2135_v42  ;;  %v1071_v27 = vpop.f32.mrb[55].mxu0  ;;  %v1465_v9 = vpop.f32.mrb[55].mxu1  ;;  %v3172_v24 = vmax.f32 %v3170_v57, %v3171_v23  ;;  %v3173_v38 = vld [vmem:[#allocation5_spill] sm:$0xff] }
 0x149   :  { %1670 = vst.msk [vmem:[%s3094_s3 + $0x68] sm:$0xff] %vm1656_vm3, %v1633_v49  ;;  %v1557_v1 = vmax.f32 %v1163_v41, %v1462_v46  ;;  %v1164_v12 = vmax.f32 %v3164_v2, %v1071_v27  ;;  %v3175_v46 = vmax.f32 %v3173_v38, %v3174_v39  ;;  %v3179_v2 = vld [vmem:[#allocation9_spill] sm:$0xff] }
 0x14a   :  { %v1602_v44 = vadd.f32 %v2804_v43, %v1559_v62  ;;  %v1560_v45 = vmax.f32 %v1166_v26, %v2175_v55  ;;  %v3176_v55 = vld [vmem:[#allocation7_spill] sm:$0xff]  ;;  %v3177_v62 = vld [vmem:[#allocation8_spill] sm:$0xff] }
 0x14b   :  { %v1600_v14 = vadd.f32 %v2804_v43, %v1557_v1  ;;  %v1558_v29 = vmax.f32 %v1164_v12, %v1465_v9  ;;  %v3178_v63 = vmax.f32 %v3176_v55, %v3177_v62  ;;  %v3180_v12 = vld [vmem:[#allocation10_spill] sm:$0xff] }
 0x14c   :  { %v1638_v4 = vmax.f32 %v1602_v44, 0.0  ;;  %v1603_v5 = vadd.f32 %v2804_v43, %v1560_v45  ;;  %v3181_v44 = vmax.f32 %v3179_v2, %v3180_v12 }
 0x14d   :  { %v1636_v30 = vmax.f32 %v1600_v14, 0.0  ;;  %v1601_v15 = vadd.f32 %v2804_v43, %v1558_v29  ;;  %v2138_v47 = vpop.f32.mrb[56].mxu0  ;;  %v2178_v48 = vpop.f32.mrb[56].mxu1 }
 0x14e   :  { %1675 = vst.msk [vmem:[%s3094_s3 + $0x90] sm:$0xff] %vm1656_vm3, %v1638_v4  ;;  %v1639_v7 = vmax.f32 %v1603_v5, 0.0  ;;  %v1169_v28 = vmax.f32 %v3165_v8, %v2138_v47  ;;  %v1084_v40 = vpop.f32.mrb[57].mxu0  ;;  %v1478_v17 = vpop.f32.mrb[57].mxu1 }
 0x14f   :  { %1673 = vst.msk [vmem:[%s3094_s3 + $0x80] sm:$0xff] %vm1656_vm3, %v1636_v30  ;;  %v1637_v18 = vmax.f32 %v1601_v15, 0.0  ;;  %v1167_v33 = vmax.f32 %v3166_v32, %v1084_v40  ;;  %v2139_v22 = vpop.f32.mrb[58].mxu0  ;;  %v2179_v25 = vpop.f32.mrb[58].mxu1  ;;  %v3182_v40 = vld [vmem:[#allocation11_spill] sm:$0xff] }
 0x150   :  { %1676 = vst.msk [vmem:[%s3094_s3 + $0x98] sm:$0xff] %vm1656_vm3, %v1639_v7  ;;  %v1563_v10 = vmax.f32 %v1169_v28, %v2178_v48  ;;  %v1170_v50 = vmax.f32 %v3167_v11, %v2139_v22  ;;  %v1087_v51 = vpop.f32.mrb[59].mxu0  ;;  %v1481_v6 = vpop.f32.mrb[59].mxu1  ;;  %v3186_v11 = vld [vmem:[#allocation14_spill] sm:$0xff] }
 0x151   :  { %1674 = vst.msk [vmem:[%s3094_s3 + $0x88] sm:$0xff] %vm1656_vm3, %v1637_v18  ;;  %v1561_v3 = vmax.f32 %v1167_v33, %v1478_v17  ;;  %v1168_v35 = vmax.f32 %v3169_v20, %v1087_v51  ;;  %v3183_v17 = vld [vmem:[#allocation12_spill] sm:$0xff]  ;;  %v3188_v20 = vld [vmem:[#allocation15_spill] sm:$0xff] }
 0x152   :  { %v1606_v53 = vadd.f32 %v2804_v43, %v1563_v10  ;;  %v1564_v54 = vmax.f32 %v1170_v50, %v2179_v25  ;;  %v3184_v18 = vmax.f32 %v3182_v40, %v3183_v17  ;;  %v3185_v10 = vld [vmem:[#allocation13_spill] sm:$0xff] }
 0x153   :  { %v1604_v36 = vadd.f32 %v2804_v43, %v1561_v3  ;;  %v1562_v21 = vmax.f32 %v1168_v35, %v1481_v6  ;;  %v3187_v50 = vmax.f32 %v3185_v10, %v3186_v11  ;;  %v3189_v35 = vld [vmem:[#allocation16_spill] sm:$0xff] }
 0x154   :  { %v1642_v61 = vmax.f32 %v1606_v53, 0.0  ;;  %v1607_v0 = vadd.f32 %v2804_v43, %v1564_v54  ;;  %v3190_v53 = vmax.f32 %v3188_v20, %v3189_v35 }
 0x155   :  { %v1640_v31 = vmax.f32 %v1604_v36, 0.0  ;;  %v1605_v16 = vadd.f32 %v2804_v43, %v1562_v21  ;;  %v2142_v19 = vpop.f32.mrb[60].mxu0  ;;  %v2182_v56 = vpop.f32.mrb[60].mxu1 }
 0x156   :  { %1679 = vst.msk [vmem:[%s3094_s3 + $0xb0] sm:$0xff] %vm1656_vm3, %v1642_v61  ;;  %v1643_v58 = vmax.f32 %v1607_v0, 0.0  ;;  %v1173_v34 = vmax.f32 %v3172_v24, %v2142_v19  ;;  %v1100_v37 = vpop.f32.mrb[61].mxu0  ;;  %v1494_v59 = vpop.f32.mrb[61].mxu1  ;;  %v3191_v0 = vld [vmem:[#allocation17_spill] sm:$0xff] }
 0x157   :  { %1677 = vst.msk [vmem:[%s3094_s3 + $0xa0] sm:$0xff] %vm1656_vm3, %v1640_v31  ;;  %v1641_v60 = vmax.f32 %v1605_v16, 0.0  ;;  %v1171_v49 = vmax.f32 %v3175_v46, %v1100_v37  ;;  %v2143_v52 = vpop.f32.mrb[62].mxu0  ;;  %v2183_v41 = vpop.f32.mrb[62].mxu1  ;;  %v3192_v31 = vld [vmem:[#allocation18_spill] sm:$0xff]  ;;  %v3194_v46 = vld [vmem:[#allocation19_spill] sm:$0xff] }
 0x158   :  { %1680 = vst.msk [vmem:[%s3094_s3 + $0xb8] sm:$0xff] %vm1656_vm3, %v1643_v58  ;;  %v1567_v42 = vmax.f32 %v1173_v34, %v2182_v56  ;;  %v1174_v26 = vmax.f32 %v3178_v63, %v2143_v52  ;;  %v1103_v27 = vpop.f32.mrb[63].mxu0  ;;  %v1497_v9 = vpop.f32.mrb[63].mxu1  ;;  %v3193_v16 = vmax.f32 %v3191_v0, %v3192_v31  ;;  %v3197_v63 = vld [vmem:[#allocation21_spill] sm:$0xff] }
 0x159   :  { %1678 = vst.msk [vmem:[%s3094_s3 + $0xa8] sm:$0xff] %vm1656_vm3, %v1641_v60  ;;  %v1565_v1 = vmax.f32 %v1171_v49, %v1494_v59  ;;  %v1172_v45 = vmax.f32 %v3181_v44, %v1103_v27  ;;  %v3195_v49 = vld [vmem:[#allocation20_spill] sm:$0xff]  ;;  %v3200_v44 = vld [vmem:[#allocation23_spill] sm:$0xff] }
 0x15a   :  { %v1610_v14 = vadd.f32 %v2804_v43, %v1567_v42  ;;  %v1568_v29 = vmax.f32 %v1174_v26, %v2183_v41  ;;  %v3196_v52 = vmax.f32 %v3194_v46, %v3195_v49  ;;  %v3198_v26 = vld [vmem:[#allocation22_spill] sm:$0xff] }
 0x15b   :  { %v1608_v4 = vadd.f32 %v2804_v43, %v1565_v1  ;;  %v1566_v5 = vmax.f32 %v1172_v45, %v1497_v9  ;;  %v3199_v27 = vmax.f32 %v3197_v63, %v3198_v26  ;;  %v3201_v45 = vld [vmem:[#allocation24_spill] sm:$0xff] }
 0x15c   :  { %v1646_v30 = vmax.f32 %v1610_v14, 0.0  ;;  %v1611_v15 = vadd.f32 %v2804_v43, %v1568_v29  ;;  %v3202_v14 = vmax.f32 %v3200_v44, %v3201_v45 }
 0x15d   :  { %v1644_v47 = vmax.f32 %v1608_v4, 0.0  ;;  %v1609_v48 = vadd.f32 %v2804_v43, %v1566_v5  ;;  %v2146_v7 = vpop.f32.mrb[64].mxu0  ;;  %v2186_v8 = vpop.f32.mrb[64].mxu1 }
 0x15e   :  { %1683 = vst.msk [vmem:[%s3094_s3 + $0xd0] sm:$0xff] %vm1656_vm3, %v1646_v30  ;;  %v1647_v28 = vmax.f32 %v1611_v15, 0.0  ;;  %v1177_v32 = vmax.f32 %v3184_v18, %v2146_v7  ;;  %v1116_v33 = vpop.f32.mrb[65].mxu0  ;;  %v1510_v22 = vpop.f32.mrb[65].mxu1  ;;  %v3203_v15 = vld [vmem:[#allocation25_spill] sm:$0xff] }
 0x15f   :  { %1681 = vst.msk [vmem:[%s3094_s3 + $0xc0] sm:$0xff] %vm1656_vm3, %v1644_v47  ;;  %v1645_v25 = vmax.f32 %v1609_v48, 0.0  ;;  %v1175_v51 = vmax.f32 %v3187_v50, %v1116_v33  ;;  %v2147_v6 = vpop.f32.mrb[66].mxu0  ;;  %v2187_v3 = vpop.f32.mrb[66].mxu1  ;;  %v3204_v47 = vld [vmem:[#allocation26_spill] sm:$0xff] }
 0x160   :  { %1684 = vst.msk [vmem:[%s3094_s3 + $0xd8] sm:$0xff] %vm1656_vm3, %v1647_v28  ;;  %v1571_v13 = vmax.f32 %v1177_v32, %v2186_v8  ;;  %v1178_v54 = vmax.f32 %v3190_v53, %v2147_v6  ;;  %v1119_v36 = vpop.f32.mrb[67].mxu0  ;;  %v1513_v21 = vpop.f32.mrb[67].mxu1  ;;  %v3205_v48 = vmax.f32 %v3203_v15, %v3204_v47 }
 0x161   :  { %1682 = vst.msk [vmem:[%s3094_s3 + $0xc8] sm:$0xff] %vm1656_vm3, %v1645_v25  ;;  %v1569_v61 = vmax.f32 %v1175_v51, %v1510_v22  ;;  %v1176_v19 = vmax.f32 %v3193_v16, %v1119_v36 }
 0x162   :  { %v1614_v56 = vadd.f32 %v2804_v43, %v1571_v13  ;;  %v1572_v58 = vmax.f32 %v1178_v54, %v2187_v3 }
 0x163   :  { %v1612_v57 = vadd.f32 %v2804_v43, %v1569_v61  ;;  %v1570_v23 = vmax.f32 %v1176_v19, %v1513_v21 }
 0x164   :  { %v1650_v24 = vmax.f32 %v1614_v56, 0.0  ;;  %v1615_v34 = vadd.f32 %v2804_v43, %v1572_v58 }
 0x165   :  { %v1648_v37 = vmax.f32 %v1612_v57, 0.0  ;;  %v1613_v59 = vadd.f32 %v2804_v43, %v1570_v23  ;;  %v2150_v60 = vpop.f32.mrb[68].mxu0  ;;  %v2190_v38 = vpop.f32.mrb[68].mxu1 }
 0x166   :  { %1687 = vst.msk [vmem:[%s3094_s3 + $0xf0] sm:$0xff] %vm1656_vm3, %v1650_v24  ;;  %v1651_v39 = vmax.f32 %v1615_v34, 0.0  ;;  %v1181_v41 = vmax.f32 %v3196_v52, %v2150_v60  ;;  %v1132_v42 = vpop.f32.mrb[69].mxu0  ;;  %v1526_v55 = vpop.f32.mrb[69].mxu1 }
 0x167   :  { %1685 = vst.msk [vmem:[%s3094_s3 + $0xe0] sm:$0xff] %vm1656_vm3, %v1648_v37  ;;  %v1649_v62 = vmax.f32 %v1613_v59, 0.0  ;;  %v1179_v9 = vmax.f32 %v3199_v27, %v1132_v42  ;;  %v2151_v1 = vpop.f32.mrb[70].mxu0  ;;  %v2191_v2 = vpop.f32.mrb[70].mxu1 }
 0x168   :  { %1688 = vst.msk [vmem:[%s3094_s3 + $0xf8] sm:$0xff] %vm1656_vm3, %v1651_v39  ;;  %v1575_v12 = vmax.f32 %v1181_v41, %v2190_v38  ;;  %v1182_v29 = vmax.f32 %v3202_v14, %v2151_v1  ;;  %v1135_v4 = vpop.f32.mrb[71].mxu0  ;;  %v1529_v5 = vpop.f32.mrb[71].mxu1 }
 0x169   :  { %1686 = vst.msk [vmem:[%s3094_s3 + $0xe8] sm:$0xff] %vm1656_vm3, %v1649_v62  ;;  %v1573_v30 = vmax.f32 %v1179_v9, %v1526_v55  ;;  %v1180_v7 = vmax.f32 %v3205_v48, %v1135_v4 }
 0x16a   :  { %v1618_v8 = vadd.f32 %v2804_v43, %v1575_v12  ;;  %v1576_v28 = vmax.f32 %v1182_v29, %v2191_v2 }
 0x16b   :  { %v1616_v40 = vadd.f32 %v2804_v43, %v1573_v30  ;;  %v1574_v17 = vmax.f32 %v1180_v7, %v1529_v5 }
 0x16c   :  { %v1654_v18 = vmax.f32 %v1618_v8, 0.0  ;;  %v1619_v32 = vadd.f32 %v2804_v43, %v1576_v28 }
 0x16d   :  { %v1652_v33 = vmax.f32 %v1616_v40, 0.0  ;;  %v1617_v22 = vadd.f32 %v2804_v43, %v1574_v17 }
 0x16e   :  { %1691 = vst.msk [vmem:[%s3094_s3 + $0x110] sm:$0xff] %vm1656_vm3, %v1654_v18  ;;  %v1655_v25 = vmax.f32 %v1619_v32, 0.0 }
 0x16f   :  { %1689 = vst.msk [vmem:[%s3094_s3 + $0x100] sm:$0xff] %vm1656_vm3, %v1652_v33  ;;  %v1653_v10 = vmax.f32 %v1617_v22, 0.0 }
 0x170   :  { %1692 = vst.msk [vmem:[%s3094_s3 + $0x118] sm:$0xff] %vm1656_vm3, %v1655_v25 }
 0x171   :  { %1690 = vst.msk [vmem:[%s3094_s3 + $0x108] sm:$0xff] %vm1656_vm3, %v1653_v10 }

// kernel: emnist_forward.4
= control target key start
LH: loop header
LB: loop body
LE: loop exit
PB: predicated region body
PF: predicated region fallthrough
CT: control target
= control target key end

     0   :  { %v525_v0 = vmov 0   ;;  %vm113_vm0 = vcmask 179200   ;;  %vm120_vm1 = vcmask 1042432   ;;  %vm434_vm2 = vcmask 130048   ;;  %s739_s1 = inlined_call_operand.vmem [shape: bf16[150,16], index: 1, kind: input, shape index: {}]   ;;  %s740_s0 = inlined_call_operand.vmem [shape: bf16[4,32,150], index: 0, kind: input, shape index: {}]   ;;  %s741_s2 = inlined_call_operand.vmem [shape: f32[1,16], index: 2, kind: input, shape index: {}]   ;;  %s742_s3 = inlined_call_operand.vmem [shape: f32[32,16], index: 3, kind: output, shape index: {}]  }
   0x1   :  { %124 = vmatprep.subr.bf16.mxu0 %v525_v0  ;;  %202 = vmatprep.subr.bf16.mxu1 %v525_v0  ;;  %v551_v1 = vld [vmem:[%s739_s1] sm:$0xff]   ;;  %v558_v2 = vld [vmem:[%s739_s1 + $0x8] sm:$0xff]   ;;  %v567_v3 = vld [vmem:[%s739_s1 + $0x10] sm:$0xff]  }
   0x2   :  { %125 = vmatpush1.bf16.msra.mxu0 %v551_v1  ;;  %203 = vmatpush1.bf16.msra.mxu1 %v551_v1  ;;  %v576_v4 = vld [vmem:[%s739_s1 + $0x18] sm:$0xff]   ;;  %v503_v5 = vld [vmem:[%s740_s0 + $0x4] ss:$8 sps:$4 sm:$0xff]   ;;  %v611_v9 = vld [vmem:[%s739_s1 + $0x30] sm:$0xff]  }
   0x3   :  { %126 = vmatprep.subr.bf16.mxu0 %v525_v0  ;;  %204 = vmatprep.subr.bf16.mxu1 %v525_v0  ;;  %v506_v6 = vld [vmem:[%s740_s0 + $0x24] ss:$8 sps:$4 sm:$0xff]   ;;  %v620_v10 = vld [vmem:[%s739_s1 + $0x38] sm:$0xff]   ;;  %v500_v12 = vld [vmem:[%s739_s1 + $0x48] ss:$0 sps:$4 sm:$0x77]  }
   0x4   :  { %457 = vmatprep.mubr.msk.bf16.mxu0 %vm113_vm0, %v503_v5  ;;  %v592_v7 = vld [vmem:[%s739_s1 + $0x20] sm:$0xff]   ;;  %467 = vmatprep.mubr.msk.bf16.mxu1 %vm113_vm0, %v506_v6  ;;  %v602_v8 = vld [vmem:[%s739_s1 + $0x28] sm:$0xff]   ;;  %v122_v13 = vsel %vm120_vm1, %v500_v12, 0  ;;  %v507_v16 = vld [vmem:[%s740_s0 + $0x14] ss:$8 sps:$4 sm:$0xff]  }
   0x5   :  { %v499_v11 = vld [vmem:[%s739_s1 + $0x40] sm:$0xff]   ;;  %v510_v17 = vld [vmem:[%s740_s0 + $0x34] ss:$8 sps:$4 sm:$0xff]   ;;  %v509_v18 = vld [vmem:[%s740_s0 + $0x10] ss:$8 sps:$4 sm:$0xff]  }
   0x6   :  { %127 = vmatpush1.bf16.msra.mxu0 %v558_v2  ;;  %205 = vmatpush1.bf16.msra.mxu1 %v558_v2  ;;  %v501_v14 = vld [vmem:[%s740_s0] ss:$8 sps:$4 sm:$0xff]   ;;  %v512_v19 = vld [vmem:[%s740_s0 + $0x30] ss:$8 sps:$4 sm:$0xff]   ;;  %v515_v20 = vld [vmem:[%s740_s0 + $0x44] ss:$8 sps:$4 sm:$0xff]  }
   0x7   :  { %128 = vmatprep.subr.bf16.mxu0 %v525_v0  ;;  %206 = vmatprep.subr.bf16.mxu1 %v525_v0  ;;  %v504_v15 = vld [vmem:[%s740_s0 + $0x20] ss:$8 sps:$4 sm:$0xff]   ;;  %v518_v21 = vld [vmem:[%s740_s0 + $0x64] ss:$8 sps:$4 sm:$0xff]   ;;  %v519_v24 = vld [vmem:[%s740_s0 + $0x54] ss:$8 sps:$4 sm:$0xff]  }
   0x8   :  { %v513_v22 = vld [vmem:[%s740_s0 + $0x40] ss:$8 sps:$4 sm:$0xff]   ;;  %v521_v25 = vld [vmem:[%s740_s0 + $0x74] ss:$8 sps:$4 sm:$0xff]   ;;  %v523_v26 = vld [vmem:[%s740_s0 + $0x50] ss:$8 sps:$4 sm:$0xff]  }
   0x9   :  { %v516_v23 = vld [vmem:[%s740_s0 + $0x60] ss:$8 sps:$4 sm:$0xff]   ;;  %v524_v27 = vld [vmem:[%s740_s0 + $0x70] ss:$8 sps:$4 sm:$0xff]  }
   0xa   :  { %129 = vmatpush1.bf16.msra.mxu0 %v567_v3  ;;  %207 = vmatpush1.bf16.msra.mxu1 %v567_v3  ;;  %v489_v53 = vld [vmem:[%s741_s2] ss:$0 sm:$0xff] }
   0xb   :  { %130 = vmatprep.subr.bf16.mxu0 %v525_v0  ;;  %208 = vmatprep.subr.bf16.mxu1 %v525_v0 }
   0xe   :  { %131 = vmatpush1.bf16.msra.mxu0 %v576_v4  ;;  %209 = vmatpush1.bf16.msra.mxu1 %v576_v4 }
   0xf   :  { %132 = vmatprep.subr.bf16.mxu0 %v525_v0  ;;  %210 = vmatprep.subr.bf16.mxu1 %v525_v0 }
  0x12   :  { %133 = vmatpush1.bf16.msra.mxu0 %v592_v7  ;;  %211 = vmatpush1.bf16.msra.mxu1 %v592_v7 }
  0x13   :  { %134 = vmatprep.subr.bf16.mxu0 %v525_v0  ;;  %212 = vmatprep.subr.bf16.mxu1 %v525_v0 }
  0x16   :  { %135 = vmatpush1.bf16.msra.mxu0 %v602_v8  ;;  %213 = vmatpush1.bf16.msra.mxu1 %v602_v8 }
  0x17   :  { %136 = vmatprep.subr.bf16.mxu0 %v525_v0  ;;  %214 = vmatprep.subr.bf16.mxu1 %v525_v0 }
  0x1a   :  { %137 = vmatpush1.bf16.msra.mxu0 %v611_v9  ;;  %215 = vmatpush1.bf16.msra.mxu1 %v611_v9 }
  0x1b   :  { %138 = vmatprep.subr.bf16.mxu0 %v525_v0  ;;  %216 = vmatprep.subr.bf16.mxu1 %v525_v0 }
  0x1e   :  { %139 = vmatpush1.bf16.msra.mxu0 %v620_v10  ;;  %217 = vmatpush1.bf16.msra.mxu1 %v620_v10 }
  0x1f   :  { %140 = vmatprep.subr.bf16.mxu0 %v525_v0  ;;  %218 = vmatprep.subr.bf16.mxu1 %v525_v0 }
  0x22   :  { %141 = vmatpush1.bf16.msra.mxu0 %v499_v11  ;;  %219 = vmatpush1.bf16.msra.mxu1 %v499_v11 }
  0x23   :  { %142 = vmatprep.subr.bf16.mxu0 %v525_v0  ;;  %220 = vmatprep.subr.bf16.mxu1 %v525_v0 }
  0x26   :  { %143 = vmatpush1.bf16.msra.mxu0 %v122_v13  ;;  %221 = vmatpush1.bf16.msra.mxu1 %v122_v13 }
  0x27   :  { %284 = vmatprep.subr.bf16.mxu0 %v525_v0  ;;  %366 = vmatprep.subr.bf16.mxu1 %v525_v0 }
  0x29   :  { %157 = vmatmul.mubr.bf16.vlgmr.msra.gmra.mrb[0].mxu0 %v501_v14  ;;  %235 = vmatmul.mubr.bf16.vlgmr.msra.gmra.mrb[0].mxu1 %v504_v15 }
  0x2a   :  { %285 = vmatpush1.bf16.msra.mxu0 %v551_v1  ;;  %367 = vmatpush1.bf16.msra.mxu1 %v551_v1 }
  0x2b   :  { %286 = vmatprep.subr.bf16.mxu0 %v525_v0  ;;  %368 = vmatprep.subr.bf16.mxu1 %v525_v0 }
  0x2c   :  { %458 = vmatprep.mubr.msk.bf16.mxu0 %vm113_vm0, %v507_v16  ;;  %468 = vmatprep.mubr.msk.bf16.mxu1 %vm113_vm0, %v510_v17 }
  0x2e   :  { %287 = vmatpush1.bf16.msra.mxu0 %v558_v2  ;;  %369 = vmatpush1.bf16.msra.mxu1 %v558_v2 }
  0x2f   :  { %288 = vmatprep.subr.bf16.mxu0 %v525_v0  ;;  %370 = vmatprep.subr.bf16.mxu1 %v525_v0 }
  0x31   :  { %165 = vmatmul.mubr.bf16.gmra.mrb[4].mxu0 %v509_v18  ;;  %243 = vmatmul.mubr.bf16.gmra.mrb[4].mxu1 %v512_v19 }
  0x32   :  { %289 = vmatpush1.bf16.msra.mxu0 %v567_v3  ;;  %371 = vmatpush1.bf16.msra.mxu1 %v567_v3 }
  0x33   :  { %290 = vmatprep.subr.bf16.mxu0 %v525_v0  ;;  %372 = vmatprep.subr.bf16.mxu1 %v525_v0 }
  0x34   :  { %477 = vmatprep.mubr.msk.bf16.mxu0 %vm113_vm0, %v515_v20  ;;  %487 = vmatprep.mubr.msk.bf16.mxu1 %vm113_vm0, %v518_v21 }
  0x36   :  { %291 = vmatpush1.bf16.msra.mxu0 %v576_v4  ;;  %373 = vmatpush1.bf16.msra.mxu1 %v576_v4 }
  0x37   :  { %292 = vmatprep.subr.bf16.mxu0 %v525_v0  ;;  %374 = vmatprep.subr.bf16.mxu1 %v525_v0 }
  0x3a   :  { %293 = vmatpush1.bf16.msra.mxu0 %v592_v7  ;;  %375 = vmatpush1.bf16.msra.mxu1 %v592_v7 }
  0x3b   :  { %294 = vmatprep.subr.bf16.mxu0 %v525_v0  ;;  %376 = vmatprep.subr.bf16.mxu1 %v525_v0 }
  0x3e   :  { %295 = vmatpush1.bf16.msra.mxu0 %v602_v8  ;;  %377 = vmatpush1.bf16.msra.mxu1 %v602_v8 }
  0x3f   :  { %296 = vmatprep.subr.bf16.mxu0 %v525_v0  ;;  %378 = vmatprep.subr.bf16.mxu1 %v525_v0 }
  0x42   :  { %297 = vmatpush1.bf16.msra.mxu0 %v611_v9  ;;  %379 = vmatpush1.bf16.msra.mxu1 %v611_v9 }
  0x43   :  { %298 = vmatprep.subr.bf16.mxu0 %v525_v0  ;;  %380 = vmatprep.subr.bf16.mxu1 %v525_v0 }
  0x46   :  { %299 = vmatpush1.bf16.msra.mxu0 %v620_v10  ;;  %381 = vmatpush1.bf16.msra.mxu1 %v620_v10 }
  0x47   :  { %300 = vmatprep.subr.bf16.mxu0 %v525_v0  ;;  %382 = vmatprep.subr.bf16.mxu1 %v525_v0 }
  0x4a   :  { %301 = vmatpush1.bf16.msra.mxu0 %v499_v11  ;;  %383 = vmatpush1.bf16.msra.mxu1 %v499_v11 }
  0x4b   :  { %302 = vmatprep.subr.bf16.mxu0 %v525_v0  ;;  %384 = vmatprep.subr.bf16.mxu1 %v525_v0 }
  0x4e   :  { %303 = vmatpush1.bf16.msra.mxu0 %v122_v13  ;;  %385 = vmatpush1.bf16.msra.mxu1 %v122_v13 }
  0x51   :  { %317 = vmatmul.mubr.bf16.vlgmr.msra.gmra.mrb[8].mxu0 %v513_v22  ;;  %399 = vmatmul.mubr.bf16.vlgmr.msra.gmra.mrb[8].mxu1 %v516_v23 }
  0x52   :  { %478 = vmatprep.mubr.msk.bf16.mxu0 %vm113_vm0, %v519_v24  ;;  %488 = vmatprep.mubr.msk.bf16.mxu1 %vm113_vm0, %v521_v25 }
  0x59   :  { %325 = vmatmul.mubr.bf16.gmra.mrb[12].mxu0 %v523_v26  ;;  %407 = vmatmul.mubr.bf16.gmra.mrb[12].mxu1 %v524_v27 }
  0xfc   :  { %v158_v28 = vpop.f32.mrb[0].mxu0  ;;  %v236_v29 = vpop.f32.mrb[0].mxu1 }
  0xfd   :  { %v251_v30 = vmax.f32 %v158_v28, %v236_v29  ;;  %v160_v31 = vpop.f32.mrb[1].mxu0  ;;  %v238_v32 = vpop.f32.mrb[1].mxu1 }
  0xfe   :  { %v161_v33 = vpop.f32.mrb[2].mxu0  ;;  %v239_v34 = vpop.f32.mrb[2].mxu1 }
  0xff   :  { %v252_v35 = vmax.f32 %v161_v33, %v239_v34  ;;  %v163_v36 = vpop.f32.mrb[3].mxu0  ;;  %v241_v37 = vpop.f32.mrb[3].mxu1 }
 0x104   :  { %v166_v38 = vpop.f32.mrb[4].mxu0  ;;  %v244_v39 = vpop.f32.mrb[4].mxu1 }
 0x105   :  { %v168_v40 = vpop.f32.mrb[5].mxu0  ;;  %v253_v41 = vmax.f32 %v166_v38, %v244_v39  ;;  %v246_v42 = vpop.f32.mrb[5].mxu1 }
 0x106   :  { %v169_v43 = vpop.f32.mrb[6].mxu0  ;;  %v247_v44 = vpop.f32.mrb[6].mxu1 }
 0x107   :  { %v171_v45 = vpop.f32.mrb[7].mxu0  ;;  %v254_v46 = vmax.f32 %v169_v43, %v247_v44  ;;  %v249_v47 = vpop.f32.mrb[7].mxu1 }
 0x124   :  { %v318_v48 = vpop.f32.mrb[8].mxu0  ;;  %v400_v49 = vpop.f32.mrb[8].mxu1 }
 0x125   :  { %v333_v50 = vmax.f32 %v251_v30, %v318_v48  ;;  %v320_v51 = vpop.f32.mrb[9].mxu0  ;;  %v402_v52 = vpop.f32.mrb[9].mxu1 }
 0x126   :  { %v321_v54 = vpop.f32.mrb[10].mxu0  ;;  %v403_v55 = vpop.f32.mrb[10].mxu1 }
 0x127   :  { %v415_v56 = vmax.f32 %v333_v50, %v400_v49  ;;  %v334_v57 = vmax.f32 %v252_v35, %v321_v54  ;;  %v323_v58 = vpop.f32.mrb[11].mxu0  ;;  %v405_v59 = vpop.f32.mrb[11].mxu1 }
 0x129   :  { %v426_v60 = vadd.f32 %v489_v53, %v415_v56  ;;  %v416_v61 = vmax.f32 %v334_v57, %v403_v55 }
 0x12b   :  { %v430_v62 = vmax.f32 %v426_v60, 0.0  ;;  %v427_v63 = vadd.f32 %v489_v53, %v416_v61 }
 0x12c   :  { %v326_v0 = vpop.f32.mrb[12].mxu0  ;;  %v408_v1 = vpop.f32.mrb[12].mxu1 }
 0x12d   :  { %435 = vst.msk [vmem:[%s742_s3] sm:$0xff] %vm434_vm2, %v430_v62  ;;  %v431_v2 = vmax.f32 %v427_v63, 0.0  ;;  %v335_v3 = vmax.f32 %v253_v41, %v326_v0  ;;  %v328_v4 = vpop.f32.mrb[13].mxu0  ;;  %v410_v5 = vpop.f32.mrb[13].mxu1 }
 0x12e   :  { %v329_v6 = vpop.f32.mrb[14].mxu0  ;;  %v411_v7 = vpop.f32.mrb[14].mxu1 }
 0x12f   :  { %436 = vst.msk [vmem:[%s742_s3 + $0x8] sm:$0xff] %vm434_vm2, %v431_v2  ;;  %v417_v8 = vmax.f32 %v335_v3, %v408_v1  ;;  %v336_v9 = vmax.f32 %v254_v46, %v329_v6  ;;  %v331_v10 = vpop.f32.mrb[15].mxu0  ;;  %v413_v11 = vpop.f32.mrb[15].mxu1 }
 0x131   :  { %v428_v12 = vadd.f32 %v489_v53, %v417_v8  ;;  %v418_v13 = vmax.f32 %v336_v9, %v411_v7 }
 0x133   :  { %v432_v14 = vmax.f32 %v428_v12, 0.0  ;;  %v429_v15 = vadd.f32 %v489_v53, %v418_v13 }
 0x135   :  { %437 = vst.msk [vmem:[%s742_s3 + $0x10] sm:$0xff] %vm434_vm2, %v432_v14  ;;  %v433_v16 = vmax.f32 %v429_v15, 0.0 }
 0x137   :  { %438 = vst.msk [vmem:[%s742_s3 + $0x18] sm:$0xff] %vm434_vm2, %v433_v16 }

// kernel: emnist_forward.5
= control target key start
LH: loop header
LB: loop body
LE: loop exit
PB: predicated region body
PF: predicated region fallthrough
CT: control target
= control target key end

     0   :  { %v578_v1 = vmov 0.0   ;;  %vm283_vm0 = vcmask 1043456   ;;  %vm579_vm1 = vmmov 0   ;;  %vm279_vm2 = vcmask 982016   ;;  %s741_s1 = inlined_call_operand.vmem [shape: bf16[256,120], index: 1, kind: input, shape index: {}]   ;;  %s742_s0 = inlined_call_operand.vmem [shape: bf16[8,256], index: 0, kind: input, shape index: {}]   ;;  %s743_s3 = inlined_call_operand.vmem [shape: bf16[120,84], index: 3, kind: input, shape index: {}]   ;;  %s744_s5 = inlined_call_operand.vmem [shape: bf16[84,128], index: 5, kind: input, shape index: {}]   ;;  %s745_s2 = inlined_call_operand.vmem [shape: f32[1,120], index: 2, kind: input, shape index: {}]   ;;  %s746_s4 = inlined_call_operand.vmem [shape: f32[1,84], index: 4, kind: input, shape index: {}]   ;;  %s747_s6 = inlined_call_operand.vmem [shape: f32[1,128], index: 6, kind: input, shape index: {}]   ;;  %s748_s7 = inlined_call_operand.vmem [shape: f32[8,128], index: 7, kind: output, shape index: {}]  }
   0x1   :  { %v546_v0 = vld [vmem:[%s741_s1 + $0x40] sm:$0xff]   ;;  %508 = vmatprep.subr.bf16.mxu1 %v578_v1  ;;  %v548_v3 = vld [vmem:[%s741_s1 + $0x48] sm:$0xff]   ;;  %v550_v5 = vld [vmem:[%s741_s1 + $0x50] sm:$0xff]   ;;  %524 = vmatprep.mubr.msk.bf16.mxu1 %vm579_vm1, %v578_v1  ;;  %vm384_vm3 = vcmask 1041408   ;;  %vm380_vm4 = vcmask 687104  }
   0x2   :  { %v547_v2 = vld [vmem:[%s741_s1] sm:$0xff]   ;;  %470 = vmatprep.subr.bf16.mxu0 %v546_v0  ;;  %v549_v4 = vld [vmem:[%s741_s1 + $0x8] sm:$0xff]   ;;  %v551_v6 = vld [vmem:[%s741_s1 + $0x10] sm:$0xff]  }
   0x3   :  { %471 = vmatpush3.bf16.msra.mxu0 %v547_v2  ;;  %v552_v7 = vld [vmem:[%s741_s1 + $0x58] sm:$0xff]   ;;  %v554_v9 = vld [vmem:[%s741_s1 + $0x60] sm:$0xff]   ;;  %v556_v11 = vld [vmem:[%s741_s1 + $0x68] sm:$0xff]  }
   0x4   :  { %472 = vmatprep.subr.bf16.mxu0 %v548_v3  ;;  %v553_v8 = vld [vmem:[%s741_s1 + $0x18] sm:$0xff]   ;;  %v555_v10 = vld [vmem:[%s741_s1 + $0x20] sm:$0xff]   ;;  %v557_v15 = vld [vmem:[%s741_s1 + $0x28] sm:$0xff]  }
   0x5   :  { %v27_v12 = vld [vmem:[%s742_s0] sm:$0xff]  ;;  %v558_v16 = vld [vmem:[%s741_s1 + $0x70] sm:$0xff]   ;;  %v565_v17 = vld [vmem:[%s743_s3 + $0x8] sm:$0xff]  }
   0x6   :  { %v435_v13 = vcombine.high %v27_v12, %v27_v12  ;;  %v564_v14 = vld [vmem:[%s743_s3] sm:$0xff]   ;;  %v559_v18 = vld [vmem:[%s741_s1 + $0x30] sm:$0xff]   ;;  %v560_v19 = vld [vmem:[%s741_s1 + $0x78] sm:$0xff]   ;;  %v434_v23 = vcombine.low %v27_v12, %v27_v12 }
   0x7   :  { %473 = vmatpush3.bf16.msra.mxu0 %v549_v4  ;;  %509 = vmatpush3.bf16.msra.mxu1 %v564_v14  ;;  %v566_v20 = vld [vmem:[%s743_s3 + $0x10] sm:$0xff]   ;;  %v561_v21 = vld [vmem:[%s741_s1 + $0x38] sm:$0xff]   ;;  %v568_v24 = vld [vmem:[%s743_s3 + $0x20] sm:$0xff]  }
   0x8   :  { %474 = vmatprep.subr.bf16.mxu0 %v550_v5  ;;  %202 = vmatprep.mubr.bf16.mxu0 %v435_v13  ;;  %v567_v22 = vld [vmem:[%s743_s3 + $0x18] sm:$0xff]   ;;  %v569_v25 = vld [vmem:[%s743_s3 + $0x28] sm:$0xff]   ;;  %v570_v26 = vld [vmem:[%s743_s3 + $0x30] sm:$0xff]  }
   0x9   :  { %510 = vmatprep.subr.bf16.mxu1 %v578_v1  ;;  %v571_v27 = vld [vmem:[%s743_s3 + $0x38] ss:$0 sps:$4 sm:$0xff]   ;;  %v572_v29 = vld [vmem:[%s744_s5] sm:$0xff]   ;;  %v573_v30 = vld [vmem:[%s744_s5 + $0x8] sm:$0xff]  }
   0xa   :  { %v285_v28 = vsel %vm283_vm0, %v571_v27, 0  ;;  %v574_v31 = vld [vmem:[%s744_s5 + $0x10] sm:$0xff]   ;;  %v575_v32 = vld [vmem:[%s744_s5 + $0x18] sm:$0xff]   ;;  %v433_v34 = vld [vmem:[%s745_s2] ss:$0 sm:$0xff] }
   0xb   :  { %475 = vmatpush3.bf16.msra.mxu0 %v551_v6  ;;  %511 = vmatpush3.bf16.msra.mxu1 %v565_v17  ;;  %v576_v42 = vld [vmem:[%s744_s5 + $0x20] sm:$0xff]   ;;  %v577_v43 = vld [vmem:[%s744_s5 + $0x28] ss:$0 sps:$4 sm:$0x33]  }
   0xc   :  { %476 = vmatprep.subr.bf16.mxu0 %v552_v7  ;;  %512 = vmatprep.subr.bf16.mxu1 %v578_v1  ;;  %v386_v44 = vsel %vm384_vm3, %v577_v43, 0  ;;  %v452_v45 = vld [vmem:[%s746_s4] ss:$0 sm:$0xff] }
   0xd   :  { %v462_v53 = vld [vmem:[%s747_s6] ss:$0 sm:$0xff] }
   0xf   :  { %477 = vmatpush3.bf16.msra.mxu0 %v553_v8  ;;  %513 = vmatpush3.bf16.msra.mxu1 %v566_v20 }
  0x10   :  { %478 = vmatprep.subr.bf16.mxu0 %v554_v9  ;;  %514 = vmatprep.subr.bf16.mxu1 %v578_v1 }
  0x13   :  { %479 = vmatpush3.bf16.msra.mxu0 %v555_v10  ;;  %515 = vmatpush3.bf16.msra.mxu1 %v567_v22 }
  0x14   :  { %480 = vmatprep.subr.bf16.mxu0 %v556_v11  ;;  %516 = vmatprep.subr.bf16.mxu1 %v578_v1 }
  0x17   :  { %481 = vmatpush3.bf16.msra.mxu0 %v557_v15  ;;  %517 = vmatpush3.bf16.msra.mxu1 %v568_v24 }
  0x18   :  { %482 = vmatprep.subr.bf16.mxu0 %v558_v16  ;;  %518 = vmatprep.subr.bf16.mxu1 %v578_v1 }
  0x1b   :  { %483 = vmatpush3.bf16.msra.mxu0 %v559_v18  ;;  %519 = vmatpush3.bf16.msra.mxu1 %v569_v25 }
  0x1c   :  { %484 = vmatprep.subr.bf16.mxu0 %v560_v19  ;;  %520 = vmatprep.subr.bf16.mxu1 %v578_v1 }
  0x1f   :  { %485 = vmatpush3.bf16.msra.mxu0 %v561_v21  ;;  %521 = vmatpush3.bf16.msra.mxu1 %v570_v26 }
  0x20   :  { %528 = vmatprep.subr.bf16.mxu0 %v578_v1  ;;  %522 = vmatprep.subr.bf16.mxu1 %v578_v1 }
  0x22   :  { %203 = vmatmul.mubr.bf16.vlgmr.msra.gmra.mrb[0].mxu0 %v434_v23 }
  0x23   :  { %523 = vmatpush3.bf16.msra.mxu1 %v285_v28  ;;  %540 = vmatprep.mubr.msk.bf16.mxu0 %vm579_vm1, %v578_v1 }
  0x24   :  { %529 = vmatpush3.bf16.msra.mxu0 %v572_v29 }
  0x25   :  { %530 = vmatprep.subr.bf16.mxu0 %v578_v1 }
  0x28   :  { %531 = vmatpush3.bf16.msra.mxu0 %v573_v30 }
  0x29   :  { %532 = vmatprep.subr.bf16.mxu0 %v578_v1 }
  0x2c   :  { %533 = vmatpush3.bf16.msra.mxu0 %v574_v31 }
  0x2d   :  { %534 = vmatprep.subr.bf16.mxu0 %v578_v1 }
  0x30   :  { %535 = vmatpush3.bf16.msra.mxu0 %v575_v32 }
  0x31   :  { %536 = vmatprep.subr.bf16.mxu0 %v578_v1 }
  0x34   :  { %537 = vmatpush3.bf16.msra.mxu0 %v576_v42 }
  0x35   :  { %538 = vmatprep.subr.bf16.mxu0 %v578_v1 }
  0x38   :  { %539 = vmatpush3.bf16.msra.mxu0 %v386_v44 }
  0xf5   :  { %v486_v33 = vpop.f32.mrb[0].mxu0 }
  0xf6   :  { %v487_v35 = vpop.f32.mrb[1].mxu0 }
  0xf7   :  { %v488_v36 = vadd.f32 %v487_v35, %v486_v33  ;;  %v489_v37 = vpop.f32.mrb[2].mxu0 }
  0xf8   :  { %v490_v38 = vpop.f32.mrb[3].mxu0 }
  0xf9   :  { %v205_v39 = vadd.f32 %v488_v36, %v433_v34 }
  0xfb   :  { %v210_v40 = vmax.f32 %v205_v39, 0.0 }
  0xfd   :  { %v211_v41 = vpack.c.bf16 %v210_v40, %v210_v40 }
  0xff   :  { %525 = vmatmul.mubr.msk.bf16.vlgmr.msra.gmra.mrb[0].mxu1 %vm279_vm2, %v211_v41 }
 0x1d2   :  { %v321_v46 = vpop.f32.mrb[0].mxu1 }
 0x1d3   :  { %v322_v47 = vadd.f32 %v452_v45, %v321_v46  ;;  %v526_v48 = vpop.f32.mrb[1].mxu1 }
 0x1d4   :  { %v324_v49 = vpop.f32.mrb[2].mxu1 }
 0x1d5   :  { %v327_v50 = vmax.f32 %v322_v47, 0.0  ;;  %v527_v51 = vpop.f32.mrb[3].mxu1 }
 0x1d7   :  { %v328_v52 = vpack.c.bf16 %v327_v50, %v327_v50 }
 0x1d9   :  { %541 = vmatmul.mubr.msk.bf16.vlgmr.msra.gmra.mrb[4].mxu0 %vm380_vm4, %v328_v52 }
 0x2ac   :  { %v422_v54 = vpop.f32.mrb[4].mxu0 }
 0x2ad   :  { %v423_v55 = vadd.f32 %v462_v53, %v422_v54  ;;  %v542_v56 = vpop.f32.mrb[5].mxu0 }
 0x2ae   :  { %v425_v57 = vpop.f32.mrb[6].mxu0 }
 0x2af   :  { %428 = vst [vmem:[%s748_s7] sm:$0xff] %v423_v55  ;;  %v543_v58 = vpop.f32.mrb[7].mxu0 }

</bundles_post_ra>
